<compile_context>
chip_gen: v7x
topology: tpu7x:2x2x1
jax: 0.10.0
libtpu: 0.0.40
codegen_flags: <defaults>
</compile_context>

<pallas_src>
import math

import jax
import jax.numpy as jnp
from jax.experimental import pallas as pl
from jax.experimental.pallas import tpu as pltpu

# Hyperparameters from the PyTorch module
D_MODEL = 64
DIM_FF = 128
FEATURE_DIM = 7
NHEAD = 4
NUM_LAYERS = 3
HEAD_DIM = D_MODEL // NHEAD
LN_EPS = 1e-5
F_PAD = 8                      # padded feature dim
MXU_DTYPE = jnp.bfloat16       # MXU operand dtype (accumulation stays f32)


def _layer_norm(y, w, b):
    # one-pass statistics: var = E[y^2] - mean^2 (biased, matches PyTorch),
    # clamped at 0 for near-constant (e.g. padded) rows.
    mu = jnp.mean(y, axis=-1, keepdims=True)
    ms = jnp.mean(y * y, axis=-1, keepdims=True)
    var = jnp.maximum(ms - mu * mu, 0.0)
    return (y - mu) * jax.lax.rsqrt(var + LN_EPS) * w + b


def transformer_kernel(x_ref, seg_ref, w_in_ref, b_in_ref,
                       wqkv_ref, bqkv_ref, wo_ref,
                       w1_ref, b1_ref, w2_ref,
                       p64_ref, wout_t_ref, bout_ref,
                       out_ref):
    TB, S, FP = x_ref.shape
    R = TB * S                        # flattened (batch, seq) rows
    D = D_MODEL
    M = NHEAD * S                     # packed (head, key) axis

    # seg[h*S+k, d] = 1 iff dim d belongs to head h (block-diagonal mask /
    # per-head-sum matrix).
    seg = seg_ref[...]                                                 # (M, D) bf16

    # ---- input_layer: Linear(feature_dim, d_model), rows flattened ----
    x2d = x_ref[...].reshape(R, FP)
    h = jnp.dot(x2d.astype(MXU_DTYPE), w_in_ref[...],
                preferred_element_type=jnp.float32) + b_in_ref[...]    # (R, D) f32

    wqkv = wqkv_ref[...]; bqkv = bqkv_ref[...]
    wo = wo_ref[...]
    w1 = w1_ref[...]; b1 = b1_ref[...]
    w2 = w2_ref[...]
    p64 = p64_ref[...]

    for l in range(NUM_LAYERS):
        bo_l   = p64[l, 0:1, :]
        ln1w_l = p64[l, 1:2, :]
        ln1b_l = p64[l, 2:3, :]
        b2_l   = p64[l, 3:4, :]
        ln2w_l = p64[l, 4:5, :]
        ln2b_l = p64[l, 5:6, :]

        # ---- multi-head self-attention (eval mode: no mask) ----
        # fused QKV projection over all (batch, seq) rows at once;
        # 1/sqrt(head_dim) is pre-folded into the Q columns of wqkv/bqkv.
        qkv = jnp.dot(h.astype(MXU_DTYPE), wqkv[l],
                      preferred_element_type=jnp.float32) + bqkv[l]    # (R, 3D)
        q3 = qkv[:, 0:D].reshape(TB, S, D).astype(MXU_DTYPE)
        k3 = qkv[:, D:2 * D].reshape(TB, S, D).astype(MXU_DTYPE)
        v3 = qkv[:, 2 * D:3 * D].reshape(TB, S, D).astype(MXU_DTYPE)

        # Block-diagonal head packing: Kbd[b, h*S+k, :] = K[b, k, :] masked to
        # head h's 16 dims.  No per-head concats / 16-lane slices, and only
        # one batched matmul per stage instead of NHEAD.
        kb = jnp.tile(k3, (1, NHEAD, 1)) * seg                         # (TB, M, D)
        vb = jnp.tile(v3, (1, NHEAD, 1)) * seg                         # (TB, M, D)

        sc = jnp.einsum('bqd,bkd->bqk', q3, kb,
                        preferred_element_type=jnp.float32)            # (TB, S, M)
        # Row max over the packed axis is a per-head-constant shift -> exact
        # softmax, single 32-lane-wide reduce.
        sc = sc - jnp.max(sc, axis=-1, keepdims=True)
        p = jnp.exp(sc).astype(MXU_DTYPE)                              # (TB, S, M)

        pv = jnp.einsum('bqk,bkd->bqd', p, vb,
                        preferred_element_type=jnp.float32)            # (TB, S, D)
        # per-head softmax denominator, already broadcast to each head's
        # output dims, via one (R, M) @ (M, D) matmul.
        den = jnp.dot(p.reshape(R, M), seg,
                      preferred_element_type=jnp.float32)              # (R, D)
        attn = pv.reshape(R, D) * pl.reciprocal(jnp.maximum(den, 1e-30),
                                                approx=True)
        attn = jnp.dot(attn.astype(MXU_DTYPE), wo[l],
                       preferred_element_type=jnp.float32) + bo_l      # (R, D)
        # TODO(synk): dropout is a no-op at inference (eval mode); training-mode
        # dropout is intentionally not implemented.
        h = _layer_norm(h + attn, ln1w_l, ln1b_l)                      # post-norm

        # ---- feed-forward: linear2(relu(linear1(x))) ----
        ff = jnp.dot(h.astype(MXU_DTYPE), w1[l],
                     preferred_element_type=jnp.float32) + b1[l]       # (R, DIM_FF)
        ff = jnp.maximum(ff, 0.0)
        ff = jnp.dot(ff.astype(MXU_DTYPE), w2[l],
                     preferred_element_type=jnp.float32) + b2_l        # (R, D)
        h = _layer_norm(h + ff, ln2w_l, ln2b_l)                        # post-norm

    # ---- last sequence position -> Linear(64, 1), lane-dense (1,1,TB) store ----
    last = h.reshape(TB, S, D)[:, S - 1, :]                            # (TB, D)
    out_row = jnp.einsum('od,bd->ob', wout_t_ref[...], last.astype(MXU_DTYPE),
                         preferred_element_type=jnp.float32) + bout_ref[...]
    out_ref[...] = out_row.reshape(1, 1, TB)


def make_params(key):
    kit = iter(jax.random.split(key, 64))

    def uinit(shape, fan_in):
        bound = 1.0 / math.sqrt(fan_in)
        return jax.random.uniform(next(kit), shape, jnp.float32, -bound, bound)

    p = {}
    p['w_in'] = uinit((FEATURE_DIM, D_MODEL), FEATURE_DIM)     # Linear(7, 64) (pre-T)
    p['b_in'] = uinit((1, D_MODEL), FEATURE_DIM)

    wqkv, bqkv, wo, bo = [], [], [], []
    ln1w, ln1b, w1, b1, w2, b2, ln2w, ln2b = ([] for _ in range(8))
    for _ in range(NUM_LAYERS):
        wqkv.append(uinit((D_MODEL, 3 * D_MODEL), D_MODEL))    # in_proj (pre-T, [Q|K|V])
        bqkv.append(uinit((1, 3 * D_MODEL), D_MODEL))
        wo.append(uinit((D_MODEL, D_MODEL), D_MODEL))          # out_proj (pre-T)
        bo.append(uinit((1, D_MODEL), D_MODEL))
        ln1w.append(jnp.ones((1, D_MODEL), jnp.float32))
        ln1b.append(jnp.zeros((1, D_MODEL), jnp.float32))
        w1.append(uinit((D_MODEL, DIM_FF), D_MODEL))           # Linear(64, 128) (pre-T)
        b1.append(uinit((1, DIM_FF), D_MODEL))
        w2.append(uinit((DIM_FF, D_MODEL), DIM_FF))            # Linear(128, 64) (pre-T)
        b2.append(uinit((1, D_MODEL), DIM_FF))
        ln2w.append(jnp.ones((1, D_MODEL), jnp.float32))
        ln2b.append(jnp.zeros((1, D_MODEL), jnp.float32))

    stack = lambda xs: jnp.stack(xs, axis=0)
    p.update(wqkv=stack(wqkv), bqkv=stack(bqkv), wo=stack(wo), bo=stack(bo),
             ln1w=stack(ln1w), ln1b=stack(ln1b),
             w1=stack(w1), b1=stack(b1), w2=stack(w2), b2=stack(b2),
             ln2w=stack(ln2w), ln2b=stack(ln2b))

    p['w_out'] = uinit((D_MODEL, 1), D_MODEL)                  # Linear(64, 1) (pre-T)
    p['b_out'] = uinit((1, 1), D_MODEL)
    return p


def _prepare_kernel_args(params):
    """One-time weight transforms: fold 1/sqrt(head_dim) into Q, zero-pad w_in
    rows 7->8, pack small per-layer f32 params into one array, cast MXU weight
    operands to bf16 (biases / LN params stay f32)."""
    scale = 1.0 / math.sqrt(HEAD_DIM)
    wqkv = params['wqkv'].at[:, :, :D_MODEL].multiply(scale)
    bqkv = params['bqkv'].at[:, :, :D_MODEL].multiply(scale)
    w_in = jnp.pad(params['w_in'], ((0, F_PAD - FEATURE_DIM), (0, 0)))
    p64 = jnp.concatenate([params['bo'], params['ln1w'], params['ln1b'],
                           params['b2'], params['ln2w'], params['ln2b']],
                          axis=1)                               # (L, 6, 64) f32
    mx = lambda w: w.astype(MXU_DTYPE)
    return (mx(w_in), params['b_in'],
            mx(wqkv), bqkv, mx(params['wo']),
            mx(params['w1']), params['b1'], mx(params['w2']),
            p64, mx(params['w_out'].T), params['b_out'])


def transformer_forward(x, params, block_b=256):
    # x: (B, feature_dim, seq) like the PyTorch 3-D input (or (B, feature_dim)).
    if x.ndim == 2:
        x = x[..., None]                                        # (B, F, 1)
    x = jnp.transpose(x, (0, 2, 1)).astype(jnp.float32)         # (B, S, F)
    B, S, F = x.shape
    x = jnp.pad(x, ((0, 0), (0, 0), (0, F_PAD - F)))            # zero-pad F -> 8

    # batch tile: large tiles amortize fixed per-layer vector work; once B is
    # non-trivial force >= 2 grid steps so ("parallel",) shards the grid
    # across v7x's two TensorCores (no-op on v5e/v6e).
    tb = min(block_b, B)
    if B >= 16:
        tb = min(tb, (B + 1) // 2)
    nb = (B + tb - 1) // tb
    b_pad = nb * tb
    if b_pad != B:
        x = jnp.pad(x, ((0, b_pad - B), (0, 0), (0, 0)))

    # segment matrix seg[h*S+k, d] = 1 iff d // HEAD_DIM == h (bf16 constant)
    d_head = jnp.arange(D_MODEL, dtype=jnp.int32) // HEAD_DIM
    j_head = jnp.arange(NHEAD * S, dtype=jnp.int32) // S
    segmat = (j_head[:, None] == d_head[None, :]).astype(MXU_DTYPE)

    args = (x, segmat) + _prepare_kernel_args(params)

    def full_spec(a):                                           # grid-invariant
        nd = a.ndim
        return pl.BlockSpec(a.shape, lambda i, _nd=nd: (0,) * _nd)

    out = pl.pallas_call(
        transformer_kernel,
        out_shape=jax.ShapeDtypeStruct((nb, 1, tb), jnp.float32),
        grid=(nb,),
        in_specs=[pl.BlockSpec((tb, S, F_PAD), lambda i: (i, 0, 0))]
                 + [full_spec(a) for a in args[1:]],
        out_specs=pl.BlockSpec((1, 1, tb), lambda i: (i, 0, 0)),
        compiler_params=pltpu.CompilerParams(
            dimension_semantics=("parallel",),                  # 2-TC sharding on v7x
            vmem_limit_bytes=48 * 1024 * 1024),                 # <= v7x 64 MiB physical
    )(*args)
    return out.reshape(b_pad)[:B].reshape(B, 1)


if __name__ == "__main__":
    key = jax.random.PRNGKey(0)
    pkey, xkey = jax.random.split(key)
    params = make_params(pkey)

    B, S = 2, 8
    x = jax.random.normal(xkey, (B, FEATURE_DIM, S), jnp.float32)   # (B, 7, 8)

    out = jax.block_until_ready(transformer_forward(x, params))
    assert out.shape == (B, 1) and out.dtype == jnp.float32
    assert bool(jnp.all(jnp.isfinite(out)))

    # multi-step grid path (2 blocks) must agree with the single-block path
    out2 = jax.block_until_ready(transformer_forward(x, params, block_b=1))
    assert bool(jnp.allclose(out, out2, atol=1e-3, rtol=1e-3))

    print("KERNEL_OK")
</pallas_src>

<mosaic_0001>
module attributes {stable_mosaic.version = 11 : i64} {
  func.func @transformer_kernel(%arg0: i32, %arg1: memref<2x8x8xf32, #tpu.memory_space<vmem>>, %arg2: memref<32x64xbf16, #tpu.memory_space<vmem>>, %arg3: memref<8x64xbf16, #tpu.memory_space<vmem>>, %arg4: memref<1x64xf32, #tpu.memory_space<vmem>>, %arg5: memref<3x64x192xbf16, #tpu.memory_space<vmem>>, %arg6: memref<3x1x192xf32, #tpu.memory_space<vmem>>, %arg7: memref<3x64x64xbf16, #tpu.memory_space<vmem>>, %arg8: memref<3x64x128xbf16, #tpu.memory_space<vmem>>, %arg9: memref<3x1x128xf32, #tpu.memory_space<vmem>>, %arg10: memref<3x128x64xbf16, #tpu.memory_space<vmem>>, %arg11: memref<3x6x64xf32, #tpu.memory_space<vmem>>, %arg12: memref<1x64xbf16, #tpu.memory_space<vmem>>, %arg13: memref<1x1xf32, #tpu.memory_space<vmem>>, %arg14: memref<1x1x2xf32, #tpu.memory_space<vmem>>) attributes {dimension_semantics = [#tpu.dimension_semantics<parallel>], iteration_bounds = array<i64: 1>, scalar_prefetch = 0 : i64, scratch_operands = 0 : i64, tpu.core_type = #tpu.core_type<tc>, window_params = [{transform_indices = @transform_0, window_bounds = array<i64: 2, 8, 8>}, {pipeline_mode = #tpu.pipeline_mode<synchronous>, transform_indices = @transform_1, window_bounds = array<i64: 32, 64>}, {pipeline_mode = #tpu.pipeline_mode<synchronous>, transform_indices = @transform_2, window_bounds = array<i64: 8, 64>}, {pipeline_mode = #tpu.pipeline_mode<synchronous>, transform_indices = @transform_3, window_bounds = array<i64: 1, 64>}, {pipeline_mode = #tpu.pipeline_mode<synchronous>, transform_indices = @transform_4, window_bounds = array<i64: 3, 64, 192>}, {pipeline_mode = #tpu.pipeline_mode<synchronous>, transform_indices = @transform_5, window_bounds = array<i64: 3, 1, 192>}, {pipeline_mode = #tpu.pipeline_mode<synchronous>, transform_indices = @transform_6, window_bounds = array<i64: 3, 64, 64>}, {pipeline_mode = #tpu.pipeline_mode<synchronous>, transform_indices = @transform_7, window_bounds = array<i64: 3, 64, 128>}, {pipeline_mode = #tpu.pipeline_mode<synchronous>, transform_indices = @transform_8, window_bounds = array<i64: 3, 1, 128>}, {pipeline_mode = #tpu.pipeline_mode<synchronous>, transform_indices = @transform_9, window_bounds = array<i64: 3, 128, 64>}, {pipeline_mode = #tpu.pipeline_mode<synchronous>, transform_indices = @transform_10, window_bounds = array<i64: 3, 6, 64>}, {pipeline_mode = #tpu.pipeline_mode<synchronous>, transform_indices = @transform_11, window_bounds = array<i64: 1, 64>}, {pipeline_mode = #tpu.pipeline_mode<synchronous>, transform_indices = @transform_12, window_bounds = array<i64: 1, 1>}, {transform_indices = @transform_13, window_bounds = array<i64: 1, 1, 2>}]} {
    %c0 = arith.constant 0 : index
    %c0_0 = arith.constant 0 : index
    %0 = vector.load %arg2[%c0, %c0_0] : memref<32x64xbf16, #tpu.memory_space<vmem>>, vector<32x64xbf16>
    %c0_1 = arith.constant 0 : index
    %c0_2 = arith.constant 0 : index
    %c0_3 = arith.constant 0 : index
    %1 = vector.load %arg1[%c0_1, %c0_2, %c0_3] : memref<2x8x8xf32, #tpu.memory_space<vmem>>, vector<2x8x8xf32>
    %2 = vector.shape_cast %1 : vector<2x8x8xf32> to vector<16x8xf32>
    %3 = arith.truncf %2 : vector<16x8xf32> to vector<16x8xbf16>
    %c0_4 = arith.constant 0 : index
    %c0_5 = arith.constant 0 : index
    %4 = vector.load %arg3[%c0_4, %c0_5] : memref<8x64xbf16, #tpu.memory_space<vmem>>, vector<8x64xbf16>
    %cst = arith.constant dense<0.000000e+00> : vector<16x64xf32>
    %5 = tpu.matmul %3, %4, %cst {dimension_numbers = #tpu.dot_dimension_numbers<[1], [0], [0], [1], [0, 0, 1, 1], [], []>} : vector<16x8xbf16>, vector<8x64xbf16>, vector<16x64xf32> -> vector<16x64xf32>
    %c0_6 = arith.constant 0 : index
    %c0_7 = arith.constant 0 : index
    %6 = vector.load %arg4[%c0_6, %c0_7] : memref<1x64xf32, #tpu.memory_space<vmem>>, vector<1x64xf32>
    %7 = vector.broadcast %6 : vector<1x64xf32> to vector<16x64xf32>
    %8 = arith.addf %5, %7 : vector<16x64xf32>
    %c0_8 = arith.constant 0 : index
    %c0_9 = arith.constant 0 : index
    %c0_10 = arith.constant 0 : index
    %9 = vector.load %arg5[%c0_8, %c0_9, %c0_10] : memref<3x64x192xbf16, #tpu.memory_space<vmem>>, vector<3x64x192xbf16>
    %c0_11 = arith.constant 0 : index
    %c0_12 = arith.constant 0 : index
    %c0_13 = arith.constant 0 : index
    %10 = vector.load %arg6[%c0_11, %c0_12, %c0_13] : memref<3x1x192xf32, #tpu.memory_space<vmem>>, vector<3x1x192xf32>
    %c0_14 = arith.constant 0 : index
    %c0_15 = arith.constant 0 : index
    %c0_16 = arith.constant 0 : index
    %11 = vector.load %arg7[%c0_14, %c0_15, %c0_16] : memref<3x64x64xbf16, #tpu.memory_space<vmem>>, vector<3x64x64xbf16>
    %c0_17 = arith.constant 0 : index
    %c0_18 = arith.constant 0 : index
    %c0_19 = arith.constant 0 : index
    %12 = vector.load %arg8[%c0_17, %c0_18, %c0_19] : memref<3x64x128xbf16, #tpu.memory_space<vmem>>, vector<3x64x128xbf16>
    %c0_20 = arith.constant 0 : index
    %c0_21 = arith.constant 0 : index
    %c0_22 = arith.constant 0 : index
    %13 = vector.load %arg9[%c0_20, %c0_21, %c0_22] : memref<3x1x128xf32, #tpu.memory_space<vmem>>, vector<3x1x128xf32>
    %c0_23 = arith.constant 0 : index
    %c0_24 = arith.constant 0 : index
    %c0_25 = arith.constant 0 : index
    %14 = vector.load %arg10[%c0_23, %c0_24, %c0_25] : memref<3x128x64xbf16, #tpu.memory_space<vmem>>, vector<3x128x64xbf16>
    %c0_26 = arith.constant 0 : index
    %c0_27 = arith.constant 0 : index
    %c0_28 = arith.constant 0 : index
    %15 = vector.load %arg11[%c0_26, %c0_27, %c0_28] : memref<3x6x64xf32, #tpu.memory_space<vmem>>, vector<3x6x64xf32>
    %16 = vector.extract_strided_slice %15 {offsets = [0, 0, 0], sizes = [1, 1, 64], strides = [1, 1, 1]} : vector<3x6x64xf32> to vector<1x1x64xf32>
    %17 = vector.shape_cast %16 : vector<1x1x64xf32> to vector<1x64xf32>
    %18 = vector.extract_strided_slice %15 {offsets = [0, 1, 0], sizes = [1, 1, 64], strides = [1, 1, 1]} : vector<3x6x64xf32> to vector<1x1x64xf32>
    %19 = vector.shape_cast %18 : vector<1x1x64xf32> to vector<1x64xf32>
    %20 = vector.extract_strided_slice %15 {offsets = [0, 2, 0], sizes = [1, 1, 64], strides = [1, 1, 1]} : vector<3x6x64xf32> to vector<1x1x64xf32>
    %21 = vector.shape_cast %20 : vector<1x1x64xf32> to vector<1x64xf32>
    %22 = vector.extract_strided_slice %15 {offsets = [0, 3, 0], sizes = [1, 1, 64], strides = [1, 1, 1]} : vector<3x6x64xf32> to vector<1x1x64xf32>
    %23 = vector.shape_cast %22 : vector<1x1x64xf32> to vector<1x64xf32>
    %24 = vector.extract_strided_slice %15 {offsets = [0, 4, 0], sizes = [1, 1, 64], strides = [1, 1, 1]} : vector<3x6x64xf32> to vector<1x1x64xf32>
    %25 = vector.shape_cast %24 : vector<1x1x64xf32> to vector<1x64xf32>
    %26 = vector.extract_strided_slice %15 {offsets = [0, 5, 0], sizes = [1, 1, 64], strides = [1, 1, 1]} : vector<3x6x64xf32> to vector<1x1x64xf32>
    %27 = vector.shape_cast %26 : vector<1x1x64xf32> to vector<1x64xf32>
    %28 = arith.truncf %8 : vector<16x64xf32> to vector<16x64xbf16>
    %29 = vector.extract_strided_slice %9 {offsets = [0, 0, 0], sizes = [1, 64, 192], strides = [1, 1, 1]} : vector<3x64x192xbf16> to vector<1x64x192xbf16>
    %30 = vector.shape_cast %29 : vector<1x64x192xbf16> to vector<64x192xbf16>
    %cst_29 = arith.constant dense<0.000000e+00> : vector<16x192xf32>
    %31 = tpu.matmul %28, %30, %cst_29 {dimension_numbers = #tpu.dot_dimension_numbers<[1], [0], [0], [1], [0, 0, 1, 1], [], []>} : vector<16x64xbf16>, vector<64x192xbf16>, vector<16x192xf32> -> vector<16x192xf32>
    %32 = vector.extract_strided_slice %10 {offsets = [0, 0, 0], sizes = [1, 1, 192], strides = [1, 1, 1]} : vector<3x1x192xf32> to vector<1x1x192xf32>
    %33 = vector.shape_cast %32 : vector<1x1x192xf32> to vector<1x192xf32>
    %34 = vector.broadcast %33 : vector<1x192xf32> to vector<16x192xf32>
    %35 = arith.addf %31, %34 : vector<16x192xf32>
    %36 = vector.extract_strided_slice %35 {offsets = [0, 0], sizes = [16, 64], strides = [1, 1]} : vector<16x192xf32> to vector<16x64xf32>
    %37 = vector.shape_cast %36 : vector<16x64xf32> to vector<2x8x64xf32>
    %38 = arith.truncf %37 : vector<2x8x64xf32> to vector<2x8x64xbf16>
    %39 = vector.extract_strided_slice %35 {offsets = [0, 64], sizes = [16, 64], strides = [1, 1]} : vector<16x192xf32> to vector<16x64xf32>
    %40 = vector.shape_cast %39 : vector<16x64xf32> to vector<2x8x64xf32>
    %41 = arith.truncf %40 : vector<2x8x64xf32> to vector<2x8x64xbf16>
    %42 = vector.extract_strided_slice %35 {offsets = [0, 128], sizes = [16, 64], strides = [1, 1]} : vector<16x192xf32> to vector<16x64xf32>
    %43 = vector.shape_cast %42 : vector<16x64xf32> to vector<2x8x64xf32>
    %44 = arith.truncf %43 : vector<2x8x64xf32> to vector<2x8x64xbf16>
    %45 = tpu.concatenate %41, %41, %41, %41 in 1 : vector<2x8x64xbf16>, vector<2x8x64xbf16>, vector<2x8x64xbf16>, vector<2x8x64xbf16> -> vector<2x32x64xbf16>
    %46 = vector.shape_cast %0 : vector<32x64xbf16> to vector<1x32x64xbf16>
    %47 = vector.broadcast %46 : vector<1x32x64xbf16> to vector<2x32x64xbf16>
    %48 = arith.mulf %45, %47 : vector<2x32x64xbf16>
    %49 = tpu.concatenate %44, %44, %44, %44 in 1 : vector<2x8x64xbf16>, vector<2x8x64xbf16>, vector<2x8x64xbf16>, vector<2x8x64xbf16> -> vector<2x32x64xbf16>
    %50 = vector.shape_cast %0 : vector<32x64xbf16> to vector<1x32x64xbf16>
    %51 = vector.broadcast %50 : vector<1x32x64xbf16> to vector<2x32x64xbf16>
    %52 = arith.mulf %49, %51 : vector<2x32x64xbf16>
    "tpu.trace_start"() <{level = 10 : i32, message = "bqd,bkd->bqk"}> : () -> ()
    %cst_30 = arith.constant dense<0.000000e+00> : vector<2x8x32xf32>
    %53 = tpu.matmul %38, %48, %cst_30 {dimension_numbers = #tpu.dot_dimension_numbers<[2], [2], [1], [1], [0, 0, 0, 1, 1, 1], [0], [0]>} : vector<2x8x64xbf16>, vector<2x32x64xbf16>, vector<2x8x32xf32> -> vector<2x8x32xf32>
    "tpu.trace_stop"() : () -> ()
    %cst_31 = arith.constant dense<0xFF800000> : vector<2x8xf32>
    %54 = vector.multi_reduction <maximumf>, %53, %cst_31 [2] : vector<2x8x32xf32> to vector<2x8xf32>
    %55 = vector.shape_cast %54 : vector<2x8xf32> to vector<2x8x1xf32>
    %56 = vector.broadcast %55 : vector<2x8x1xf32> to vector<2x8x32xf32>
    %57 = arith.subf %53, %56 : vector<2x8x32xf32>
    %58 = math.exp %57 : vector<2x8x32xf32>
    %59 = arith.truncf %58 : vector<2x8x32xf32> to vector<2x8x32xbf16>
    "tpu.trace_start"() <{level = 10 : i32, message = "bqk,bkd->bqd"}> : () -> ()
    %cst_32 = arith.constant dense<0.000000e+00> : vector<2x8x64xf32>
    %60 = tpu.matmul %59, %52, %cst_32 {dimension_numbers = #tpu.dot_dimension_numbers<[2], [1], [1], [2], [0, 0, 0, 1, 1, 2], [0], [0]>} : vector<2x8x32xbf16>, vector<2x32x64xbf16>, vector<2x8x64xf32> -> vector<2x8x64xf32>
    "tpu.trace_stop"() : () -> ()
    %61 = vector.shape_cast %59 : vector<2x8x32xbf16> to vector<16x32xbf16>
    %cst_33 = arith.constant dense<0.000000e+00> : vector<16x64xf32>
    %62 = tpu.matmul %61, %0, %cst_33 {dimension_numbers = #tpu.dot_dimension_numbers<[1], [0], [0], [1], [0, 0, 1, 1], [], []>} : vector<16x32xbf16>, vector<32x64xbf16>, vector<16x64xf32> -> vector<16x64xf32>
    %63 = vector.shape_cast %60 : vector<2x8x64xf32> to vector<16x64xf32>
    %cst_34 = arith.constant 1.000000e-30 : f32
    %64 = vector.broadcast %cst_34 : f32 to vector<16x64xf32>
    %65 = arith.maximumf %62, %64 : vector<16x64xf32>
    %66 = tpu.reciprocal %65 {approx = true} : vector<16x64xf32> -> vector<16x64xf32>
    %67 = arith.mulf %63, %66 : vector<16x64xf32>
    %68 = arith.truncf %67 : vector<16x64xf32> to vector<16x64xbf16>
    %69 = vector.extract_strided_slice %11 {offsets = [0, 0, 0], sizes = [1, 64, 64], strides = [1, 1, 1]} : vector<3x64x64xbf16> to vector<1x64x64xbf16>
    %70 = vector.shape_cast %69 : vector<1x64x64xbf16> to vector<64x64xbf16>
    %cst_35 = arith.constant dense<0.000000e+00> : vector<16x64xf32>
    %71 = tpu.matmul %68, %70, %cst_35 {dimension_numbers = #tpu.dot_dimension_numbers<[1], [0], [0], [1], [0, 0, 1, 1], [], []>} : vector<16x64xbf16>, vector<64x64xbf16>, vector<16x64xf32> -> vector<16x64xf32>
    %72 = vector.broadcast %17 : vector<1x64xf32> to vector<16x64xf32>
    %73 = arith.addf %71, %72 : vector<16x64xf32>
    %74 = arith.addf %8, %73 : vector<16x64xf32>
    %cst_36 = arith.constant dense<0.000000e+00> : vector<16xf32>
    %75 = vector.multi_reduction <add>, %74, %cst_36 [1] : vector<16x64xf32> to vector<16xf32>
    %76 = vector.shape_cast %75 : vector<16xf32> to vector<16x1xf32>
    %cst_37 = arith.constant 6.400000e+01 : f32
    %77 = vector.broadcast %cst_37 : f32 to vector<16x1xf32>
    %78 = arith.divf %76, %77 : vector<16x1xf32>
    %79 = arith.mulf %74, %74 : vector<16x64xf32>
    %cst_38 = arith.constant dense<0.000000e+00> : vector<16xf32>
    %80 = vector.multi_reduction <add>, %79, %cst_38 [1] : vector<16x64xf32> to vector<16xf32>
    %81 = vector.shape_cast %80 : vector<16xf32> to vector<16x1xf32>
    %cst_39 = arith.constant 6.400000e+01 : f32
    %82 = vector.broadcast %cst_39 : f32 to vector<16x1xf32>
    %83 = arith.divf %81, %82 : vector<16x1xf32>
    %84 = arith.mulf %78, %78 : vector<16x1xf32>
    %85 = arith.subf %83, %84 : vector<16x1xf32>
    %cst_40 = arith.constant 0.000000e+00 : f32
    %86 = vector.broadcast %cst_40 : f32 to vector<16x1xf32>
    %87 = arith.maximumf %85, %86 : vector<16x1xf32>
    %88 = vector.broadcast %78 : vector<16x1xf32> to vector<16x64xf32>
    %89 = arith.subf %74, %88 : vector<16x64xf32>
    %cst_41 = arith.constant 9.99999974E-6 : f32
    %90 = vector.broadcast %cst_41 : f32 to vector<16x1xf32>
    %91 = arith.addf %87, %90 : vector<16x1xf32>
    %92 = math.rsqrt %91 : vector<16x1xf32>
    %93 = vector.broadcast %92 : vector<16x1xf32> to vector<16x64xf32>
    %94 = arith.mulf %89, %93 : vector<16x64xf32>
    %95 = vector.broadcast %19 : vector<1x64xf32> to vector<16x64xf32>
    %96 = arith.mulf %94, %95 : vector<16x64xf32>
    %97 = vector.broadcast %21 : vector<1x64xf32> to vector<16x64xf32>
    %98 = arith.addf %96, %97 : vector<16x64xf32>
    %99 = arith.truncf %98 : vector<16x64xf32> to vector<16x64xbf16>
    %100 = vector.extract_strided_slice %12 {offsets = [0, 0, 0], sizes = [1, 64, 128], strides = [1, 1, 1]} : vector<3x64x128xbf16> to vector<1x64x128xbf16>
    %101 = vector.shape_cast %100 : vector<1x64x128xbf16> to vector<64x128xbf16>
    %cst_42 = arith.constant dense<0.000000e+00> : vector<16x128xf32>
    %102 = tpu.matmul %99, %101, %cst_42 {dimension_numbers = #tpu.dot_dimension_numbers<[1], [0], [0], [1], [0, 0, 1, 1], [], []>} : vector<16x64xbf16>, vector<64x128xbf16>, vector<16x128xf32> -> vector<16x128xf32>
    %103 = vector.extract_strided_slice %13 {offsets = [0, 0, 0], sizes = [1, 1, 128], strides = [1, 1, 1]} : vector<3x1x128xf32> to vector<1x1x128xf32>
    %104 = vector.shape_cast %103 : vector<1x1x128xf32> to vector<1x128xf32>
    %105 = vector.broadcast %104 : vector<1x128xf32> to vector<16x128xf32>
    %106 = arith.addf %102, %105 : vector<16x128xf32>
    %cst_43 = arith.constant 0.000000e+00 : f32
    %107 = vector.broadcast %cst_43 : f32 to vector<16x128xf32>
    %108 = arith.maximumf %106, %107 : vector<16x128xf32>
    %109 = arith.truncf %108 : vector<16x128xf32> to vector<16x128xbf16>
    %110 = vector.extract_strided_slice %14 {offsets = [0, 0, 0], sizes = [1, 128, 64], strides = [1, 1, 1]} : vector<3x128x64xbf16> to vector<1x128x64xbf16>
    %111 = vector.shape_cast %110 : vector<1x128x64xbf16> to vector<128x64xbf16>
    %cst_44 = arith.constant dense<0.000000e+00> : vector<16x64xf32>
    %112 = tpu.matmul %109, %111, %cst_44 {dimension_numbers = #tpu.dot_dimension_numbers<[1], [0], [0], [1], [0, 0, 1, 1], [], []>} : vector<16x128xbf16>, vector<128x64xbf16>, vector<16x64xf32> -> vector<16x64xf32>
    %113 = vector.broadcast %23 : vector<1x64xf32> to vector<16x64xf32>
    %114 = arith.addf %112, %113 : vector<16x64xf32>
    %115 = arith.addf %98, %114 : vector<16x64xf32>
    %cst_45 = arith.constant dense<0.000000e+00> : vector<16xf32>
    %116 = vector.multi_reduction <add>, %115, %cst_45 [1] : vector<16x64xf32> to vector<16xf32>
    %117 = vector.shape_cast %116 : vector<16xf32> to vector<16x1xf32>
    %cst_46 = arith.constant 6.400000e+01 : f32
    %118 = vector.broadcast %cst_46 : f32 to vector<16x1xf32>
    %119 = arith.divf %117, %118 : vector<16x1xf32>
    %120 = arith.mulf %115, %115 : vector<16x64xf32>
    %cst_47 = arith.constant dense<0.000000e+00> : vector<16xf32>
    %121 = vector.multi_reduction <add>, %120, %cst_47 [1] : vector<16x64xf32> to vector<16xf32>
    %122 = vector.shape_cast %121 : vector<16xf32> to vector<16x1xf32>
    %cst_48 = arith.constant 6.400000e+01 : f32
    %123 = vector.broadcast %cst_48 : f32 to vector<16x1xf32>
    %124 = arith.divf %122, %123 : vector<16x1xf32>
    %125 = arith.mulf %119, %119 : vector<16x1xf32>
    %126 = arith.subf %124, %125 : vector<16x1xf32>
    %cst_49 = arith.constant 0.000000e+00 : f32
    %127 = vector.broadcast %cst_49 : f32 to vector<16x1xf32>
    %128 = arith.maximumf %126, %127 : vector<16x1xf32>
    %129 = vector.broadcast %119 : vector<16x1xf32> to vector<16x64xf32>
    %130 = arith.subf %115, %129 : vector<16x64xf32>
    %cst_50 = arith.constant 9.99999974E-6 : f32
    %131 = vector.broadcast %cst_50 : f32 to vector<16x1xf32>
    %132 = arith.addf %128, %131 : vector<16x1xf32>
    %133 = math.rsqrt %132 : vector<16x1xf32>
    %134 = vector.broadcast %133 : vector<16x1xf32> to vector<16x64xf32>
    %135 = arith.mulf %130, %134 : vector<16x64xf32>
    %136 = vector.broadcast %25 : vector<1x64xf32> to vector<16x64xf32>
    %137 = arith.mulf %135, %136 : vector<16x64xf32>
    %138 = vector.broadcast %27 : vector<1x64xf32> to vector<16x64xf32>
    %139 = arith.addf %137, %138 : vector<16x64xf32>
    %140 = vector.extract_strided_slice %15 {offsets = [1, 0, 0], sizes = [1, 1, 64], strides = [1, 1, 1]} : vector<3x6x64xf32> to vector<1x1x64xf32>
    %141 = vector.shape_cast %140 : vector<1x1x64xf32> to vector<1x64xf32>
    %142 = vector.extract_strided_slice %15 {offsets = [1, 1, 0], sizes = [1, 1, 64], strides = [1, 1, 1]} : vector<3x6x64xf32> to vector<1x1x64xf32>
    %143 = vector.shape_cast %142 : vector<1x1x64xf32> to vector<1x64xf32>
    %144 = vector.extract_strided_slice %15 {offsets = [1, 2, 0], sizes = [1, 1, 64], strides = [1, 1, 1]} : vector<3x6x64xf32> to vector<1x1x64xf32>
    %145 = vector.shape_cast %144 : vector<1x1x64xf32> to vector<1x64xf32>
    %146 = vector.extract_strided_slice %15 {offsets = [1, 3, 0], sizes = [1, 1, 64], strides = [1, 1, 1]} : vector<3x6x64xf32> to vector<1x1x64xf32>
    %147 = vector.shape_cast %146 : vector<1x1x64xf32> to vector<1x64xf32>
    %148 = vector.extract_strided_slice %15 {offsets = [1, 4, 0], sizes = [1, 1, 64], strides = [1, 1, 1]} : vector<3x6x64xf32> to vector<1x1x64xf32>
    %149 = vector.shape_cast %148 : vector<1x1x64xf32> to vector<1x64xf32>
    %150 = vector.extract_strided_slice %15 {offsets = [1, 5, 0], sizes = [1, 1, 64], strides = [1, 1, 1]} : vector<3x6x64xf32> to vector<1x1x64xf32>
    %151 = vector.shape_cast %150 : vector<1x1x64xf32> to vector<1x64xf32>
    %152 = arith.truncf %139 : vector<16x64xf32> to vector<16x64xbf16>
    %153 = vector.extract_strided_slice %9 {offsets = [1, 0, 0], sizes = [1, 64, 192], strides = [1, 1, 1]} : vector<3x64x192xbf16> to vector<1x64x192xbf16>
    %154 = vector.shape_cast %153 : vector<1x64x192xbf16> to vector<64x192xbf16>
    %cst_51 = arith.constant dense<0.000000e+00> : vector<16x192xf32>
    %155 = tpu.matmul %152, %154, %cst_51 {dimension_numbers = #tpu.dot_dimension_numbers<[1], [0], [0], [1], [0, 0, 1, 1], [], []>} : vector<16x64xbf16>, vector<64x192xbf16>, vector<16x192xf32> -> vector<16x192xf32>
    %156 = vector.extract_strided_slice %10 {offsets = [1, 0, 0], sizes = [1, 1, 192], strides = [1, 1, 1]} : vector<3x1x192xf32> to vector<1x1x192xf32>
    %157 = vector.shape_cast %156 : vector<1x1x192xf32> to vector<1x192xf32>
    %158 = vector.broadcast %157 : vector<1x192xf32> to vector<16x192xf32>
    %159 = arith.addf %155, %158 : vector<16x192xf32>
    %160 = vector.extract_strided_slice %159 {offsets = [0, 0], sizes = [16, 64], strides = [1, 1]} : vector<16x192xf32> to vector<16x64xf32>
    %161 = vector.shape_cast %160 : vector<16x64xf32> to vector<2x8x64xf32>
    %162 = arith.truncf %161 : vector<2x8x64xf32> to vector<2x8x64xbf16>
    %163 = vector.extract_strided_slice %159 {offsets = [0, 64], sizes = [16, 64], strides = [1, 1]} : vector<16x192xf32> to vector<16x64xf32>
    %164 = vector.shape_cast %163 : vector<16x64xf32> to vector<2x8x64xf32>
    %165 = arith.truncf %164 : vector<2x8x64xf32> to vector<2x8x64xbf16>
    %166 = vector.extract_strided_slice %159 {offsets = [0, 128], sizes = [16, 64], strides = [1, 1]} : vector<16x192xf32> to vector<16x64xf32>
    %167 = vector.shape_cast %166 : vector<16x64xf32> to vector<2x8x64xf32>
    %168 = arith.truncf %167 : vector<2x8x64xf32> to vector<2x8x64xbf16>
    %169 = tpu.concatenate %165, %165, %165, %165 in 1 : vector<2x8x64xbf16>, vector<2x8x64xbf16>, vector<2x8x64xbf16>, vector<2x8x64xbf16> -> vector<2x32x64xbf16>
    %170 = vector.shape_cast %0 : vector<32x64xbf16> to vector<1x32x64xbf16>
    %171 = vector.broadcast %170 : vector<1x32x64xbf16> to vector<2x32x64xbf16>
    %172 = arith.mulf %169, %171 : vector<2x32x64xbf16>
    %173 = tpu.concatenate %168, %168, %168, %168 in 1 : vector<2x8x64xbf16>, vector<2x8x64xbf16>, vector<2x8x64xbf16>, vector<2x8x64xbf16> -> vector<2x32x64xbf16>
    %174 = vector.shape_cast %0 : vector<32x64xbf16> to vector<1x32x64xbf16>
    %175 = vector.broadcast %174 : vector<1x32x64xbf16> to vector<2x32x64xbf16>
    %176 = arith.mulf %173, %175 : vector<2x32x64xbf16>
    "tpu.trace_start"() <{level = 10 : i32, message = "bqd,bkd->bqk"}> : () -> ()
    %cst_52 = arith.constant dense<0.000000e+00> : vector<2x8x32xf32>
    %177 = tpu.matmul %162, %172, %cst_52 {dimension_numbers = #tpu.dot_dimension_numbers<[2], [2], [1], [1], [0, 0, 0, 1, 1, 1], [0], [0]>} : vector<2x8x64xbf16>, vector<2x32x64xbf16>, vector<2x8x32xf32> -> vector<2x8x32xf32>
    "tpu.trace_stop"() : () -> ()
    %cst_53 = arith.constant dense<0xFF800000> : vector<2x8xf32>
    %178 = vector.multi_reduction <maximumf>, %177, %cst_53 [2] : vector<2x8x32xf32> to vector<2x8xf32>
    %179 = vector.shape_cast %178 : vector<2x8xf32> to vector<2x8x1xf32>
    %180 = vector.broadcast %179 : vector<2x8x1xf32> to vector<2x8x32xf32>
    %181 = arith.subf %177, %180 : vector<2x8x32xf32>
    %182 = math.exp %181 : vector<2x8x32xf32>
    %183 = arith.truncf %182 : vector<2x8x32xf32> to vector<2x8x32xbf16>
    "tpu.trace_start"() <{level = 10 : i32, message = "bqk,bkd->bqd"}> : () -> ()
    %cst_54 = arith.constant dense<0.000000e+00> : vector<2x8x64xf32>
    %184 = tpu.matmul %183, %176, %cst_54 {dimension_numbers = #tpu.dot_dimension_numbers<[2], [1], [1], [2], [0, 0, 0, 1, 1, 2], [0], [0]>} : vector<2x8x32xbf16>, vector<2x32x64xbf16>, vector<2x8x64xf32> -> vector<2x8x64xf32>
    "tpu.trace_stop"() : () -> ()
    %185 = vector.shape_cast %183 : vector<2x8x32xbf16> to vector<16x32xbf16>
    %cst_55 = arith.constant dense<0.000000e+00> : vector<16x64xf32>
    %186 = tpu.matmul %185, %0, %cst_55 {dimension_numbers = #tpu.dot_dimension_numbers<[1], [0], [0], [1], [0, 0, 1, 1], [], []>} : vector<16x32xbf16>, vector<32x64xbf16>, vector<16x64xf32> -> vector<16x64xf32>
    %187 = vector.shape_cast %184 : vector<2x8x64xf32> to vector<16x64xf32>
    %cst_56 = arith.constant 1.000000e-30 : f32
    %188 = vector.broadcast %cst_56 : f32 to vector<16x64xf32>
    %189 = arith.maximumf %186, %188 : vector<16x64xf32>
    %190 = tpu.reciprocal %189 {approx = true} : vector<16x64xf32> -> vector<16x64xf32>
    %191 = arith.mulf %187, %190 : vector<16x64xf32>
    %192 = arith.truncf %191 : vector<16x64xf32> to vector<16x64xbf16>
    %193 = vector.extract_strided_slice %11 {offsets = [1, 0, 0], sizes = [1, 64, 64], strides = [1, 1, 1]} : vector<3x64x64xbf16> to vector<1x64x64xbf16>
    %194 = vector.shape_cast %193 : vector<1x64x64xbf16> to vector<64x64xbf16>
    %cst_57 = arith.constant dense<0.000000e+00> : vector<16x64xf32>
    %195 = tpu.matmul %192, %194, %cst_57 {dimension_numbers = #tpu.dot_dimension_numbers<[1], [0], [0], [1], [0, 0, 1, 1], [], []>} : vector<16x64xbf16>, vector<64x64xbf16>, vector<16x64xf32> -> vector<16x64xf32>
    %196 = vector.broadcast %141 : vector<1x64xf32> to vector<16x64xf32>
    %197 = arith.addf %195, %196 : vector<16x64xf32>
    %198 = arith.addf %139, %197 : vector<16x64xf32>
    %cst_58 = arith.constant dense<0.000000e+00> : vector<16xf32>
    %199 = vector.multi_reduction <add>, %198, %cst_58 [1] : vector<16x64xf32> to vector<16xf32>
    %200 = vector.shape_cast %199 : vector<16xf32> to vector<16x1xf32>
    %cst_59 = arith.constant 6.400000e+01 : f32
    %201 = vector.broadcast %cst_59 : f32 to vector<16x1xf32>
    %202 = arith.divf %200, %201 : vector<16x1xf32>
    %203 = arith.mulf %198, %198 : vector<16x64xf32>
    %cst_60 = arith.constant dense<0.000000e+00> : vector<16xf32>
    %204 = vector.multi_reduction <add>, %203, %cst_60 [1] : vector<16x64xf32> to vector<16xf32>
    %205 = vector.shape_cast %204 : vector<16xf32> to vector<16x1xf32>
    %cst_61 = arith.constant 6.400000e+01 : f32
    %206 = vector.broadcast %cst_61 : f32 to vector<16x1xf32>
    %207 = arith.divf %205, %206 : vector<16x1xf32>
    %208 = arith.mulf %202, %202 : vector<16x1xf32>
    %209 = arith.subf %207, %208 : vector<16x1xf32>
    %cst_62 = arith.constant 0.000000e+00 : f32
    %210 = vector.broadcast %cst_62 : f32 to vector<16x1xf32>
    %211 = arith.maximumf %209, %210 : vector<16x1xf32>
    %212 = vector.broadcast %202 : vector<16x1xf32> to vector<16x64xf32>
    %213 = arith.subf %198, %212 : vector<16x64xf32>
    %cst_63 = arith.constant 9.99999974E-6 : f32
    %214 = vector.broadcast %cst_63 : f32 to vector<16x1xf32>
    %215 = arith.addf %211, %214 : vector<16x1xf32>
    %216 = math.rsqrt %215 : vector<16x1xf32>
    %217 = vector.broadcast %216 : vector<16x1xf32> to vector<16x64xf32>
    %218 = arith.mulf %213, %217 : vector<16x64xf32>
    %219 = vector.broadcast %143 : vector<1x64xf32> to vector<16x64xf32>
    %220 = arith.mulf %218, %219 : vector<16x64xf32>
    %221 = vector.broadcast %145 : vector<1x64xf32> to vector<16x64xf32>
    %222 = arith.addf %220, %221 : vector<16x64xf32>
    %223 = arith.truncf %222 : vector<16x64xf32> to vector<16x64xbf16>
    %224 = vector.extract_strided_slice %12 {offsets = [1, 0, 0], sizes = [1, 64, 128], strides = [1, 1, 1]} : vector<3x64x128xbf16> to vector<1x64x128xbf16>
    %225 = vector.shape_cast %224 : vector<1x64x128xbf16> to vector<64x128xbf16>
    %cst_64 = arith.constant dense<0.000000e+00> : vector<16x128xf32>
    %226 = tpu.matmul %223, %225, %cst_64 {dimension_numbers = #tpu.dot_dimension_numbers<[1], [0], [0], [1], [0, 0, 1, 1], [], []>} : vector<16x64xbf16>, vector<64x128xbf16>, vector<16x128xf32> -> vector<16x128xf32>
    %227 = vector.extract_strided_slice %13 {offsets = [1, 0, 0], sizes = [1, 1, 128], strides = [1, 1, 1]} : vector<3x1x128xf32> to vector<1x1x128xf32>
    %228 = vector.shape_cast %227 : vector<1x1x128xf32> to vector<1x128xf32>
    %229 = vector.broadcast %228 : vector<1x128xf32> to vector<16x128xf32>
    %230 = arith.addf %226, %229 : vector<16x128xf32>
    %cst_65 = arith.constant 0.000000e+00 : f32
    %231 = vector.broadcast %cst_65 : f32 to vector<16x128xf32>
    %232 = arith.maximumf %230, %231 : vector<16x128xf32>
    %233 = arith.truncf %232 : vector<16x128xf32> to vector<16x128xbf16>
    %234 = vector.extract_strided_slice %14 {offsets = [1, 0, 0], sizes = [1, 128, 64], strides = [1, 1, 1]} : vector<3x128x64xbf16> to vector<1x128x64xbf16>
    %235 = vector.shape_cast %234 : vector<1x128x64xbf16> to vector<128x64xbf16>
    %cst_66 = arith.constant dense<0.000000e+00> : vector<16x64xf32>
    %236 = tpu.matmul %233, %235, %cst_66 {dimension_numbers = #tpu.dot_dimension_numbers<[1], [0], [0], [1], [0, 0, 1, 1], [], []>} : vector<16x128xbf16>, vector<128x64xbf16>, vector<16x64xf32> -> vector<16x64xf32>
    %237 = vector.broadcast %147 : vector<1x64xf32> to vector<16x64xf32>
    %238 = arith.addf %236, %237 : vector<16x64xf32>
    %239 = arith.addf %222, %238 : vector<16x64xf32>
    %cst_67 = arith.constant dense<0.000000e+00> : vector<16xf32>
    %240 = vector.multi_reduction <add>, %239, %cst_67 [1] : vector<16x64xf32> to vector<16xf32>
    %241 = vector.shape_cast %240 : vector<16xf32> to vector<16x1xf32>
    %cst_68 = arith.constant 6.400000e+01 : f32
    %242 = vector.broadcast %cst_68 : f32 to vector<16x1xf32>
    %243 = arith.divf %241, %242 : vector<16x1xf32>
    %244 = arith.mulf %239, %239 : vector<16x64xf32>
    %cst_69 = arith.constant dense<0.000000e+00> : vector<16xf32>
    %245 = vector.multi_reduction <add>, %244, %cst_69 [1] : vector<16x64xf32> to vector<16xf32>
    %246 = vector.shape_cast %245 : vector<16xf32> to vector<16x1xf32>
    %cst_70 = arith.constant 6.400000e+01 : f32
    %247 = vector.broadcast %cst_70 : f32 to vector<16x1xf32>
    %248 = arith.divf %246, %247 : vector<16x1xf32>
    %249 = arith.mulf %243, %243 : vector<16x1xf32>
    %250 = arith.subf %248, %249 : vector<16x1xf32>
    %cst_71 = arith.constant 0.000000e+00 : f32
    %251 = vector.broadcast %cst_71 : f32 to vector<16x1xf32>
    %252 = arith.maximumf %250, %251 : vector<16x1xf32>
    %253 = vector.broadcast %243 : vector<16x1xf32> to vector<16x64xf32>
    %254 = arith.subf %239, %253 : vector<16x64xf32>
    %cst_72 = arith.constant 9.99999974E-6 : f32
    %255 = vector.broadcast %cst_72 : f32 to vector<16x1xf32>
    %256 = arith.addf %252, %255 : vector<16x1xf32>
    %257 = math.rsqrt %256 : vector<16x1xf32>
    %258 = vector.broadcast %257 : vector<16x1xf32> to vector<16x64xf32>
    %259 = arith.mulf %254, %258 : vector<16x64xf32>
    %260 = vector.broadcast %149 : vector<1x64xf32> to vector<16x64xf32>
    %261 = arith.mulf %259, %260 : vector<16x64xf32>
    %262 = vector.broadcast %151 : vector<1x64xf32> to vector<16x64xf32>
    %263 = arith.addf %261, %262 : vector<16x64xf32>
    %264 = vector.extract_strided_slice %15 {offsets = [2, 0, 0], sizes = [1, 1, 64], strides = [1, 1, 1]} : vector<3x6x64xf32> to vector<1x1x64xf32>
    %265 = vector.shape_cast %264 : vector<1x1x64xf32> to vector<1x64xf32>
    %266 = vector.extract_strided_slice %15 {offsets = [2, 1, 0], sizes = [1, 1, 64], strides = [1, 1, 1]} : vector<3x6x64xf32> to vector<1x1x64xf32>
    %267 = vector.shape_cast %266 : vector<1x1x64xf32> to vector<1x64xf32>
    %268 = vector.extract_strided_slice %15 {offsets = [2, 2, 0], sizes = [1, 1, 64], strides = [1, 1, 1]} : vector<3x6x64xf32> to vector<1x1x64xf32>
    %269 = vector.shape_cast %268 : vector<1x1x64xf32> to vector<1x64xf32>
    %270 = vector.extract_strided_slice %15 {offsets = [2, 3, 0], sizes = [1, 1, 64], strides = [1, 1, 1]} : vector<3x6x64xf32> to vector<1x1x64xf32>
    %271 = vector.shape_cast %270 : vector<1x1x64xf32> to vector<1x64xf32>
    %272 = vector.extract_strided_slice %15 {offsets = [2, 4, 0], sizes = [1, 1, 64], strides = [1, 1, 1]} : vector<3x6x64xf32> to vector<1x1x64xf32>
    %273 = vector.shape_cast %272 : vector<1x1x64xf32> to vector<1x64xf32>
    %274 = vector.extract_strided_slice %15 {offsets = [2, 5, 0], sizes = [1, 1, 64], strides = [1, 1, 1]} : vector<3x6x64xf32> to vector<1x1x64xf32>
    %275 = vector.shape_cast %274 : vector<1x1x64xf32> to vector<1x64xf32>
    %276 = arith.truncf %263 : vector<16x64xf32> to vector<16x64xbf16>
    %277 = vector.extract_strided_slice %9 {offsets = [2, 0, 0], sizes = [1, 64, 192], strides = [1, 1, 1]} : vector<3x64x192xbf16> to vector<1x64x192xbf16>
    %278 = vector.shape_cast %277 : vector<1x64x192xbf16> to vector<64x192xbf16>
    %cst_73 = arith.constant dense<0.000000e+00> : vector<16x192xf32>
    %279 = tpu.matmul %276, %278, %cst_73 {dimension_numbers = #tpu.dot_dimension_numbers<[1], [0], [0], [1], [0, 0, 1, 1], [], []>} : vector<16x64xbf16>, vector<64x192xbf16>, vector<16x192xf32> -> vector<16x192xf32>
    %280 = vector.extract_strided_slice %10 {offsets = [2, 0, 0], sizes = [1, 1, 192], strides = [1, 1, 1]} : vector<3x1x192xf32> to vector<1x1x192xf32>
    %281 = vector.shape_cast %280 : vector<1x1x192xf32> to vector<1x192xf32>
    %282 = vector.broadcast %281 : vector<1x192xf32> to vector<16x192xf32>
    %283 = arith.addf %279, %282 : vector<16x192xf32>
    %284 = vector.extract_strided_slice %283 {offsets = [0, 0], sizes = [16, 64], strides = [1, 1]} : vector<16x192xf32> to vector<16x64xf32>
    %285 = vector.shape_cast %284 : vector<16x64xf32> to vector<2x8x64xf32>
    %286 = arith.truncf %285 : vector<2x8x64xf32> to vector<2x8x64xbf16>
    %287 = vector.extract_strided_slice %283 {offsets = [0, 64], sizes = [16, 64], strides = [1, 1]} : vector<16x192xf32> to vector<16x64xf32>
    %288 = vector.shape_cast %287 : vector<16x64xf32> to vector<2x8x64xf32>
    %289 = arith.truncf %288 : vector<2x8x64xf32> to vector<2x8x64xbf16>
    %290 = vector.extract_strided_slice %283 {offsets = [0, 128], sizes = [16, 64], strides = [1, 1]} : vector<16x192xf32> to vector<16x64xf32>
    %291 = vector.shape_cast %290 : vector<16x64xf32> to vector<2x8x64xf32>
    %292 = arith.truncf %291 : vector<2x8x64xf32> to vector<2x8x64xbf16>
    %293 = tpu.concatenate %289, %289, %289, %289 in 1 : vector<2x8x64xbf16>, vector<2x8x64xbf16>, vector<2x8x64xbf16>, vector<2x8x64xbf16> -> vector<2x32x64xbf16>
    %294 = vector.shape_cast %0 : vector<32x64xbf16> to vector<1x32x64xbf16>
    %295 = vector.broadcast %294 : vector<1x32x64xbf16> to vector<2x32x64xbf16>
    %296 = arith.mulf %293, %295 : vector<2x32x64xbf16>
    %297 = tpu.concatenate %292, %292, %292, %292 in 1 : vector<2x8x64xbf16>, vector<2x8x64xbf16>, vector<2x8x64xbf16>, vector<2x8x64xbf16> -> vector<2x32x64xbf16>
    %298 = vector.shape_cast %0 : vector<32x64xbf16> to vector<1x32x64xbf16>
    %299 = vector.broadcast %298 : vector<1x32x64xbf16> to vector<2x32x64xbf16>
    %300 = arith.mulf %297, %299 : vector<2x32x64xbf16>
    "tpu.trace_start"() <{level = 10 : i32, message = "bqd,bkd->bqk"}> : () -> ()
    %cst_74 = arith.constant dense<0.000000e+00> : vector<2x8x32xf32>
    %301 = tpu.matmul %286, %296, %cst_74 {dimension_numbers = #tpu.dot_dimension_numbers<[2], [2], [1], [1], [0, 0, 0, 1, 1, 1], [0], [0]>} : vector<2x8x64xbf16>, vector<2x32x64xbf16>, vector<2x8x32xf32> -> vector<2x8x32xf32>
    "tpu.trace_stop"() : () -> ()
    %cst_75 = arith.constant dense<0xFF800000> : vector<2x8xf32>
    %302 = vector.multi_reduction <maximumf>, %301, %cst_75 [2] : vector<2x8x32xf32> to vector<2x8xf32>
    %303 = vector.shape_cast %302 : vector<2x8xf32> to vector<2x8x1xf32>
    %304 = vector.broadcast %303 : vector<2x8x1xf32> to vector<2x8x32xf32>
    %305 = arith.subf %301, %304 : vector<2x8x32xf32>
    %306 = math.exp %305 : vector<2x8x32xf32>
    %307 = arith.truncf %306 : vector<2x8x32xf32> to vector<2x8x32xbf16>
    "tpu.trace_start"() <{level = 10 : i32, message = "bqk,bkd->bqd"}> : () -> ()
    %cst_76 = arith.constant dense<0.000000e+00> : vector<2x8x64xf32>
    %308 = tpu.matmul %307, %300, %cst_76 {dimension_numbers = #tpu.dot_dimension_numbers<[2], [1], [1], [2], [0, 0, 0, 1, 1, 2], [0], [0]>} : vector<2x8x32xbf16>, vector<2x32x64xbf16>, vector<2x8x64xf32> -> vector<2x8x64xf32>
    "tpu.trace_stop"() : () -> ()
    %309 = vector.shape_cast %307 : vector<2x8x32xbf16> to vector<16x32xbf16>
    %cst_77 = arith.constant dense<0.000000e+00> : vector<16x64xf32>
    %310 = tpu.matmul %309, %0, %cst_77 {dimension_numbers = #tpu.dot_dimension_numbers<[1], [0], [0], [1], [0, 0, 1, 1], [], []>} : vector<16x32xbf16>, vector<32x64xbf16>, vector<16x64xf32> -> vector<16x64xf32>
    %311 = vector.shape_cast %308 : vector<2x8x64xf32> to vector<16x64xf32>
    %cst_78 = arith.constant 1.000000e-30 : f32
    %312 = vector.broadcast %cst_78 : f32 to vector<16x64xf32>
    %313 = arith.maximumf %310, %312 : vector<16x64xf32>
    %314 = tpu.reciprocal %313 {approx = true} : vector<16x64xf32> -> vector<16x64xf32>
    %315 = arith.mulf %311, %314 : vector<16x64xf32>
    %316 = arith.truncf %315 : vector<16x64xf32> to vector<16x64xbf16>
    %317 = vector.extract_strided_slice %11 {offsets = [2, 0, 0], sizes = [1, 64, 64], strides = [1, 1, 1]} : vector<3x64x64xbf16> to vector<1x64x64xbf16>
    %318 = vector.shape_cast %317 : vector<1x64x64xbf16> to vector<64x64xbf16>
    %cst_79 = arith.constant dense<0.000000e+00> : vector<16x64xf32>
    %319 = tpu.matmul %316, %318, %cst_79 {dimension_numbers = #tpu.dot_dimension_numbers<[1], [0], [0], [1], [0, 0, 1, 1], [], []>} : vector<16x64xbf16>, vector<64x64xbf16>, vector<16x64xf32> -> vector<16x64xf32>
    %320 = vector.broadcast %265 : vector<1x64xf32> to vector<16x64xf32>
    %321 = arith.addf %319, %320 : vector<16x64xf32>
    %322 = arith.addf %263, %321 : vector<16x64xf32>
    %cst_80 = arith.constant dense<0.000000e+00> : vector<16xf32>
    %323 = vector.multi_reduction <add>, %322, %cst_80 [1] : vector<16x64xf32> to vector<16xf32>
    %324 = vector.shape_cast %323 : vector<16xf32> to vector<16x1xf32>
    %cst_81 = arith.constant 6.400000e+01 : f32
    %325 = vector.broadcast %cst_81 : f32 to vector<16x1xf32>
    %326 = arith.divf %324, %325 : vector<16x1xf32>
    %327 = arith.mulf %322, %322 : vector<16x64xf32>
    %cst_82 = arith.constant dense<0.000000e+00> : vector<16xf32>
    %328 = vector.multi_reduction <add>, %327, %cst_82 [1] : vector<16x64xf32> to vector<16xf32>
    %329 = vector.shape_cast %328 : vector<16xf32> to vector<16x1xf32>
    %cst_83 = arith.constant 6.400000e+01 : f32
    %330 = vector.broadcast %cst_83 : f32 to vector<16x1xf32>
    %331 = arith.divf %329, %330 : vector<16x1xf32>
    %332 = arith.mulf %326, %326 : vector<16x1xf32>
    %333 = arith.subf %331, %332 : vector<16x1xf32>
    %cst_84 = arith.constant 0.000000e+00 : f32
    %334 = vector.broadcast %cst_84 : f32 to vector<16x1xf32>
    %335 = arith.maximumf %333, %334 : vector<16x1xf32>
    %336 = vector.broadcast %326 : vector<16x1xf32> to vector<16x64xf32>
    %337 = arith.subf %322, %336 : vector<16x64xf32>
    %cst_85 = arith.constant 9.99999974E-6 : f32
    %338 = vector.broadcast %cst_85 : f32 to vector<16x1xf32>
    %339 = arith.addf %335, %338 : vector<16x1xf32>
    %340 = math.rsqrt %339 : vector<16x1xf32>
    %341 = vector.broadcast %340 : vector<16x1xf32> to vector<16x64xf32>
    %342 = arith.mulf %337, %341 : vector<16x64xf32>
    %343 = vector.broadcast %267 : vector<1x64xf32> to vector<16x64xf32>
    %344 = arith.mulf %342, %343 : vector<16x64xf32>
    %345 = vector.broadcast %269 : vector<1x64xf32> to vector<16x64xf32>
    %346 = arith.addf %344, %345 : vector<16x64xf32>
    %347 = arith.truncf %346 : vector<16x64xf32> to vector<16x64xbf16>
    %348 = vector.extract_strided_slice %12 {offsets = [2, 0, 0], sizes = [1, 64, 128], strides = [1, 1, 1]} : vector<3x64x128xbf16> to vector<1x64x128xbf16>
    %349 = vector.shape_cast %348 : vector<1x64x128xbf16> to vector<64x128xbf16>
    %cst_86 = arith.constant dense<0.000000e+00> : vector<16x128xf32>
    %350 = tpu.matmul %347, %349, %cst_86 {dimension_numbers = #tpu.dot_dimension_numbers<[1], [0], [0], [1], [0, 0, 1, 1], [], []>} : vector<16x64xbf16>, vector<64x128xbf16>, vector<16x128xf32> -> vector<16x128xf32>
    %351 = vector.extract_strided_slice %13 {offsets = [2, 0, 0], sizes = [1, 1, 128], strides = [1, 1, 1]} : vector<3x1x128xf32> to vector<1x1x128xf32>
    %352 = vector.shape_cast %351 : vector<1x1x128xf32> to vector<1x128xf32>
    %353 = vector.broadcast %352 : vector<1x128xf32> to vector<16x128xf32>
    %354 = arith.addf %350, %353 : vector<16x128xf32>
    %cst_87 = arith.constant 0.000000e+00 : f32
    %355 = vector.broadcast %cst_87 : f32 to vector<16x128xf32>
    %356 = arith.maximumf %354, %355 : vector<16x128xf32>
    %357 = arith.truncf %356 : vector<16x128xf32> to vector<16x128xbf16>
    %358 = vector.extract_strided_slice %14 {offsets = [2, 0, 0], sizes = [1, 128, 64], strides = [1, 1, 1]} : vector<3x128x64xbf16> to vector<1x128x64xbf16>
    %359 = vector.shape_cast %358 : vector<1x128x64xbf16> to vector<128x64xbf16>
    %cst_88 = arith.constant dense<0.000000e+00> : vector<16x64xf32>
    %360 = tpu.matmul %357, %359, %cst_88 {dimension_numbers = #tpu.dot_dimension_numbers<[1], [0], [0], [1], [0, 0, 1, 1], [], []>} : vector<16x128xbf16>, vector<128x64xbf16>, vector<16x64xf32> -> vector<16x64xf32>
    %361 = vector.broadcast %271 : vector<1x64xf32> to vector<16x64xf32>
    %362 = arith.addf %360, %361 : vector<16x64xf32>
    %363 = arith.addf %346, %362 : vector<16x64xf32>
    %cst_89 = arith.constant dense<0.000000e+00> : vector<16xf32>
    %364 = vector.multi_reduction <add>, %363, %cst_89 [1] : vector<16x64xf32> to vector<16xf32>
    %365 = vector.shape_cast %364 : vector<16xf32> to vector<16x1xf32>
    %cst_90 = arith.constant 6.400000e+01 : f32
    %366 = vector.broadcast %cst_90 : f32 to vector<16x1xf32>
    %367 = arith.divf %365, %366 : vector<16x1xf32>
    %368 = arith.mulf %363, %363 : vector<16x64xf32>
    %cst_91 = arith.constant dense<0.000000e+00> : vector<16xf32>
    %369 = vector.multi_reduction <add>, %368, %cst_91 [1] : vector<16x64xf32> to vector<16xf32>
    %370 = vector.shape_cast %369 : vector<16xf32> to vector<16x1xf32>
    %cst_92 = arith.constant 6.400000e+01 : f32
    %371 = vector.broadcast %cst_92 : f32 to vector<16x1xf32>
    %372 = arith.divf %370, %371 : vector<16x1xf32>
    %373 = arith.mulf %367, %367 : vector<16x1xf32>
    %374 = arith.subf %372, %373 : vector<16x1xf32>
    %cst_93 = arith.constant 0.000000e+00 : f32
    %375 = vector.broadcast %cst_93 : f32 to vector<16x1xf32>
    %376 = arith.maximumf %374, %375 : vector<16x1xf32>
    %377 = vector.broadcast %367 : vector<16x1xf32> to vector<16x64xf32>
    %378 = arith.subf %363, %377 : vector<16x64xf32>
    %cst_94 = arith.constant 9.99999974E-6 : f32
    %379 = vector.broadcast %cst_94 : f32 to vector<16x1xf32>
    %380 = arith.addf %376, %379 : vector<16x1xf32>
    %381 = math.rsqrt %380 : vector<16x1xf32>
    %382 = vector.broadcast %381 : vector<16x1xf32> to vector<16x64xf32>
    %383 = arith.mulf %378, %382 : vector<16x64xf32>
    %384 = vector.broadcast %273 : vector<1x64xf32> to vector<16x64xf32>
    %385 = arith.mulf %383, %384 : vector<16x64xf32>
    %386 = vector.broadcast %275 : vector<1x64xf32> to vector<16x64xf32>
    %387 = arith.addf %385, %386 : vector<16x64xf32>
    %388 = vector.shape_cast %387 : vector<16x64xf32> to vector<2x8x64xf32>
    %389 = vector.extract_strided_slice %388 {offsets = [0, 7, 0], sizes = [2, 1, 64], strides = [1, 1, 1]} : vector<2x8x64xf32> to vector<2x1x64xf32>
    %390 = vector.shape_cast %389 : vector<2x1x64xf32> to vector<2x64xf32>
    %c0_95 = arith.constant 0 : index
    %c0_96 = arith.constant 0 : index
    %391 = vector.load %arg12[%c0_95, %c0_96] : memref<1x64xbf16, #tpu.memory_space<vmem>>, vector<1x64xbf16>
    %392 = arith.truncf %390 : vector<2x64xf32> to vector<2x64xbf16>
    "tpu.trace_start"() <{level = 10 : i32, message = "od,bd->ob"}> : () -> ()
    %cst_97 = arith.constant dense<0.000000e+00> : vector<1x2xf32>
    %393 = tpu.matmul %391, %392, %cst_97 {dimension_numbers = #tpu.dot_dimension_numbers<[1], [1], [0], [0], [0, 0, 1, 0], [], []>} : vector<1x64xbf16>, vector<2x64xbf16>, vector<1x2xf32> -> vector<1x2xf32>
    "tpu.trace_stop"() : () -> ()
    %c0_98 = arith.constant 0 : index
    %c0_99 = arith.constant 0 : index
    %394 = vector.load %arg13[%c0_98, %c0_99] : memref<1x1xf32, #tpu.memory_space<vmem>>, vector<1x1xf32>
    %395 = vector.broadcast %394 : vector<1x1xf32> to vector<1x2xf32>
    %396 = arith.addf %393, %395 : vector<1x2xf32>
    %397 = vector.shape_cast %396 : vector<1x2xf32> to vector<1x1x2xf32>
    %c0_100 = arith.constant 0 : index
    %c0_101 = arith.constant 0 : index
    %c0_102 = arith.constant 0 : index
    %398 = vector.load %arg14[%c0_100, %c0_101, %c0_102] : memref<1x1x2xf32, #tpu.memory_space<vmem>>, vector<1x1x2xf32>
    tpu.vector_store %arg14[%c0_100, %c0_101, %c0_102], %397 {strides = array<i32>} : memref<1x1x2xf32, #tpu.memory_space<vmem>>, vector<1x1x2xf32>,
    return
  }
  func.func @transform_0(%arg0: i32) -> (i32, i32, i32) {
    %c0_i32 = arith.constant 0 : i32
    %c0_i32_0 = arith.constant 0 : i32
    %c0_i32_1 = arith.constant 0 : i32
    return %arg0, %c0_i32, %c0_i32_0 : i32, i32, i32
  }
  func.func @transform_1(%arg0: i32) -> (i32, i32) {
    %c0_i32 = arith.constant 0 : i32
    %c0_i32_0 = arith.constant 0 : i32
    %c0_i32_1 = arith.constant 0 : i32
    return %c0_i32, %c0_i32_0 : i32, i32
  }
  func.func @transform_2(%arg0: i32) -> (i32, i32) {
    %c0_i32 = arith.constant 0 : i32
    %c0_i32_0 = arith.constant 0 : i32
    %c0_i32_1 = arith.constant 0 : i32
    return %c0_i32, %c0_i32_0 : i32, i32
  }
  func.func @transform_3(%arg0: i32) -> (i32, i32) {
    %c0_i32 = arith.constant 0 : i32
    %c0_i32_0 = arith.constant 0 : i32
    %c0_i32_1 = arith.constant 0 : i32
    return %c0_i32, %c0_i32_0 : i32, i32
  }
  func.func @transform_4(%arg0: i32) -> (i32, i32, i32) {
    %c0_i32 = arith.constant 0 : i32
    %c0_i32_0 = arith.constant 0 : i32
    %c0_i32_1 = arith.constant 0 : i32
    %c0_i32_2 = arith.constant 0 : i32
    return %c0_i32, %c0_i32_0, %c0_i32_1 : i32, i32, i32
  }
  func.func @transform_5(%arg0: i32) -> (i32, i32, i32) {
    %c0_i32 = arith.constant 0 : i32
    %c0_i32_0 = arith.constant 0 : i32
    %c0_i32_1 = arith.constant 0 : i32
    %c0_i32_2 = arith.constant 0 : i32
    return %c0_i32, %c0_i32_0, %c0_i32_1 : i32, i32, i32
  }
  func.func @transform_6(%arg0: i32) -> (i32, i32, i32) {
    %c0_i32 = arith.constant 0 : i32
    %c0_i32_0 = arith.constant 0 : i32
    %c0_i32_1 = arith.constant 0 : i32
    %c0_i32_2 = arith.constant 0 : i32
    return %c0_i32, %c0_i32_0, %c0_i32_1 : i32, i32, i32
  }
  func.func @transform_7(%arg0: i32) -> (i32, i32, i32) {
    %c0_i32 = arith.constant 0 : i32
    %c0_i32_0 = arith.constant 0 : i32
    %c0_i32_1 = arith.constant 0 : i32
    %c0_i32_2 = arith.constant 0 : i32
    return %c0_i32, %c0_i32_0, %c0_i32_1 : i32, i32, i32
  }
  func.func @transform_8(%arg0: i32) -> (i32, i32, i32) {
    %c0_i32 = arith.constant 0 : i32
    %c0_i32_0 = arith.constant 0 : i32
    %c0_i32_1 = arith.constant 0 : i32
    %c0_i32_2 = arith.constant 0 : i32
    return %c0_i32, %c0_i32_0, %c0_i32_1 : i32, i32, i32
  }
  func.func @transform_9(%arg0: i32) -> (i32, i32, i32) {
    %c0_i32 = arith.constant 0 : i32
    %c0_i32_0 = arith.constant 0 : i32
    %c0_i32_1 = arith.constant 0 : i32
    %c0_i32_2 = arith.constant 0 : i32
    return %c0_i32, %c0_i32_0, %c0_i32_1 : i32, i32, i32
  }
  func.func @transform_10(%arg0: i32) -> (i32, i32, i32) {
    %c0_i32 = arith.constant 0 : i32
    %c0_i32_0 = arith.constant 0 : i32
    %c0_i32_1 = arith.constant 0 : i32
    %c0_i32_2 = arith.constant 0 : i32
    return %c0_i32, %c0_i32_0, %c0_i32_1 : i32, i32, i32
  }
  func.func @transform_11(%arg0: i32) -> (i32, i32) {
    %c0_i32 = arith.constant 0 : i32
    %c0_i32_0 = arith.constant 0 : i32
    %c0_i32_1 = arith.constant 0 : i32
    return %c0_i32, %c0_i32_0 : i32, i32
  }
  func.func @transform_12(%arg0: i32) -> (i32, i32) {
    %c0_i32 = arith.constant 0 : i32
    %c0_i32_0 = arith.constant 0 : i32
    %c0_i32_1 = arith.constant 0 : i32
    return %c0_i32, %c0_i32_0 : i32, i32
  }
  func.func @transform_13(%arg0: i32) -> (i32, i32, i32) {
    %c0_i32 = arith.constant 0 : i32
    %c0_i32_0 = arith.constant 0 : i32
    %c0_i32_1 = arith.constant 0 : i32
    return %arg0, %c0_i32, %c0_i32_0 : i32, i32, i32
  }
}

</mosaic_0001>

<bundles_post_ra>
// kernel: tpu_custom_call.1
= control target key start
LH: loop header
LB: loop body
LE: loop exit
PB: predicated region body
PF: predicated region fallthrough
CT: control target
= control target key end

     0   :  { %s4160_s0 = inlined_call_operand.hbm [shape: f32[2,8,8], index: 0, kind: input, shape index: {}]   ;;  %s4161_s1 = inlined_call_operand.hbm [shape: bf16[32,64], index: 1, kind: input, shape index: {}]   ;;  %s4162_s2 = inlined_call_operand.hbm [shape: bf16[8,64], index: 2, kind: input, shape index: {}]   ;;  %s4163_s3 = inlined_call_operand.vmem [shape: f32[1,64], index: 3, kind: input, shape index: {}]   ;;  %s4164_s4 = inlined_call_operand.vmem [shape: bf16[3,64,192], index: 4, kind: input, shape index: {}]   ;;  %s4165_s5 = inlined_call_operand.hbm [shape: f32[3,1,192], index: 5, kind: input, shape index: {}]   ;;  %s4166_s6 = inlined_call_operand.vmem [shape: bf16[3,64,64], index: 6, kind: input, shape index: {}]   ;;  %s4167_s7 = inlined_call_operand.hbm [shape: bf16[3,64,128], index: 7, kind: input, shape index: {}]   ;;  %s4168_s8 = inlined_call_operand.vmem [shape: f32[3,1,128], index: 8, kind: input, shape index: {}]   ;;  %s4169_s9 = inlined_call_operand.vmem [shape: bf16[3,128,64], index: 9, kind: input, shape index: {}]   ;;  %s4170_s10 = inlined_call_operand.vmem [shape: f32[3,6,64], index: 10, kind: input, shape index: {}]   ;;  %s4171_s11 = inlined_call_operand.vmem [shape: bf16[1,64], index: 11, kind: input, shape index: {}]   ;;  %s4172_s12 = inlined_call_operand.<no memory space> [shape: f32[1,1], index: 12, kind: input, shape index: {}]   ;;  %s4173_s13 = inlined_call_operand.hbm [shape: f32[1,1,2], index: 13, kind: output, shape index: {}]  }
   0x1   :  { %v18_v0 = vstv %s4172_s12 }
   0x2   :  { %19 = vst [vmem:[#allocation2] sm:$0x1] %v18_v0 }
   0x3   :  { %20 = vsyncpa [#allocation4], 0 }
   0x4   :  { %21 = vsyncpa [#allocation7], 0 }
   0x5   :  { %22 = vsyncpa [#allocation10], 0 }
   0x6   :  { %23 = vsyncpa [#allocation5], 0  ;;  %s3387_s27 = smov [#allocation6]   ;;  %s3247_s14 = scalar_lea.hbm %s4161_s1, 256 }
   0x7   :  { %s41_s28 = sshll.u32 %s3387_s27, 4  ;;  %p3248_p0 = scmp.ne.s32.totalorder %s4161_s1, %s3247_s14  ;;  %s42_s28 = int_to_ptr.vmem [resolvable:$true] %s41_s28 }
   0x8   :  { %p3251_p1 = scmp.lt.u32.totalorder %s3247_s14, %s4161_s1 }
   0xa   :  { %p3253_p2 = pnand %p3251_p1, %p3248_p0 }
   0xc   :  { %3256 = shalt.err (!%p3253_p2)
}
   0xd   :  { %s3257_s12 = scalar_lea.vmem %s42_s28, 256  ;;  %p3262_p4 = scmp.lt.s32.totalorder %s42_s28, %s42_s28 }
   0xe   :  { %p3258_p3 = scmp.ne.s32.totalorder %s42_s28, %s3257_s12  ;;  %p3263_p5 = scmp.lt.s32.totalorder %s3257_s12, %s3257_s12 }
  0x10   :  { %p3264_p6 = por %p3263_p5, %p3262_p4 }
  0x12   :  { %p3265_p7 = pnand %p3264_p6, %p3258_p3 }
  0x14   :  { %3268 = shalt.err (!%p3265_p7)
}
  0x15   :  { %s3388_s19 = smov 64   ;;  %s3389_s20 = smov 4  }
  0x16   :  { %47 = dma.hbm_to_vmem [thread:$0]  %s4161_s1, 256, %s42_s28, [#allocation7], %s3388_s19, %s3388_s19, %s3389_s20  }
  0x17   :  { %s3390_s23 = smov [#allocation9]   ;;  %s3269_s27 = scalar_lea.hbm %s4165_s5, 96 }
  0x18   :  { %s67_s24 = sshll.u32 %s3390_s23, 4  ;;  %p3270_p8 = scmp.ne.s32.totalorder %s4165_s5, %s3269_s27  ;;  %s68_s24 = int_to_ptr.vmem [resolvable:$true] %s67_s24 }
  0x19   :  { %p3273_p9 = scmp.lt.u32.totalorder %s3269_s27, %s4165_s5 }
  0x1b   :  { %p3275_p10 = pnand %p3273_p9, %p3270_p8 }
  0x1d   :  { %3278 = shalt.err (!%p3275_p10)
}
  0x1e   :  { %s3279_s16 = scalar_lea.vmem %s68_s24, 96  ;;  %p3284_p12 = scmp.lt.s32.totalorder %s68_s24, %s68_s24 }
  0x1f   :  { %p3280_p11 = scmp.ne.s32.totalorder %s68_s24, %s3279_s16  ;;  %p3285_p13 = scmp.lt.s32.totalorder %s3279_s16, %s3279_s16 }
  0x21   :  { %p3286_p0 = por %p3285_p13, %p3284_p12 }
  0x23   :  { %p3287_p1 = pnand %p3286_p0, %p3280_p11 }
  0x25   :  { %3290 = shalt.err (!%p3287_p1)
}
  0x26   :  { %s3391_s1 = smov 32   ;;  %s3392_s28 = smov 2  }
  0x27   :  { %73 = dma.hbm_to_vmem [thread:$0]  %s4165_s5, 96, %s68_s24, [#allocation10], %s3391_s1, %s3391_s1, %s3392_s28  }
  0x28   :  { %s3393_s12 = smov [#allocation3]   ;;  %s3291_s25 = scalar_lea.hbm %s4160_s0, 256 }
  0x29   :  { %s29_s21 = sshll.u32 %s3393_s12, 4  ;;  %p3292_p2 = scmp.ne.s32.totalorder %s4160_s0, %s3291_s25  ;;  %s30_s21 = int_to_ptr.vmem [resolvable:$true] %s29_s21 }
  0x2a   :  { %p3295_p3 = scmp.lt.u32.totalorder %s3291_s25, %s4160_s0 }
  0x2c   :  { %p3297_p4 = pnand %p3295_p3, %p3292_p2 }
  0x2e   :  { %3300 = shalt.err (!%p3297_p4)
}
  0x2f   :  { %s3301_s14 = scalar_lea.vmem %s30_s21, 256  ;;  %p3306_p6 = scmp.lt.s32.totalorder %s30_s21, %s30_s21 }
  0x30   :  { %p3302_p5 = scmp.ne.s32.totalorder %s30_s21, %s3301_s14  ;;  %p3307_p7 = scmp.lt.s32.totalorder %s3301_s14, %s3301_s14 }
  0x32   :  { %p3308_p8 = por %p3307_p7, %p3306_p6 }
  0x34   :  { %p3309_p9 = pnand %p3308_p8, %p3302_p5 }
  0x36   :  { %3312 = shalt.err (!%p3309_p9)
}
  0x37   :  { %s3394_s5 = smov 128   ;;  %s3395_s24 = smov 8  }
  0x38   :  { %35 = dma.hbm_to_vmem [thread:$0]  %s4160_s0, 256, %s30_s21, [#allocation4], %s3394_s5, %s3394_s5, %s3395_s24  }
  0x39   :  { %s3396_s1 = smov [#allocation8]   ;;  %s3397_s17 = smov [#allocation11]  }
  0x3a   :  { %s54_s28 = sshll.u32 %s3396_s1, 4  ;;  %s81_s18 = sshll.u32 %s3397_s17, 4  ;;  %s55_s28 = int_to_ptr.vmem [resolvable:$true] %s54_s28  ;;  %s82_s18 = int_to_ptr.vmem [resolvable:$true] %s81_s18 }
  0x3b   :  { %s3313_s23 = scalar_lea.hbm %s4162_s2, 64 }
  0x3c   :  { %p3314_p10 = scmp.ne.s32.totalorder %s4162_s2, %s3313_s23  ;;  %p3317_p11 = scmp.lt.u32.totalorder %s3313_s23, %s4162_s2 }
  0x3e   :  { %p3319_p12 = pnand %p3317_p11, %p3314_p10 }
  0x40   :  { %3322 = shalt.err (!%p3319_p12)
}
  0x41   :  { %s3323_s0 = scalar_lea.vmem %s55_s28, 64  ;;  %p3328_p0 = scmp.lt.s32.totalorder %s55_s28, %s55_s28 }
  0x42   :  { %p3324_p13 = scmp.ne.s32.totalorder %s55_s28, %s3323_s0  ;;  %p3329_p1 = scmp.lt.s32.totalorder %s3323_s0, %s3323_s0 }
  0x44   :  { %p3330_p2 = por %p3329_p1, %p3328_p0 }
  0x46   :  { %p3331_p3 = pnand %p3330_p2, %p3324_p13 }
  0x48   :  { %3334 = shalt.err (!%p3331_p3)
}
  0x49   :  { %57 = dma.hbm_to_vmem [thread:$0]  %s4162_s2, 64, %s55_s28, [#allocation7]  }
  0x4a   :  { %s3335_s24 = scalar_lea.hbm %s4167_s7, 1536 }
  0x4b   :  { %p3336_p4 = scmp.ne.s32.totalorder %s4167_s7, %s3335_s24  ;;  %p3339_p5 = scmp.lt.u32.totalorder %s3335_s24, %s4167_s7 }
  0x4d   :  { %p3341_p6 = pnand %p3339_p5, %p3336_p4 }
  0x4f   :  { %3344 = shalt.err (!%p3341_p6)
}
  0x50   :  { %s3345_s12 = scalar_lea.vmem %s82_s18, 1536  ;;  %p3350_p8 = scmp.lt.s32.totalorder %s82_s18, %s82_s18 }
  0x51   :  { %p3346_p7 = scmp.ne.s32.totalorder %s82_s18, %s3345_s12  ;;  %p3351_p9 = scmp.lt.s32.totalorder %s3345_s12, %s3345_s12 }
  0x53   :  { %p3352_p10 = por %p3351_p9, %p3350_p8 }
  0x55   :  { %p3353_p11 = pnand %p3352_p10, %p3346_p7 }
  0x57   :  { %3356 = shalt.err (!%p3353_p11)
}
  0x58   :  { %87 = dma.hbm_to_vmem [thread:$0]  %s4167_s7, 1536, %s82_s18, [#allocation10], %s3388_s19, %s3388_s19, %s3389_s20  }
  0x59   :  { %3379 = dma.done.wait [#allocation4], 256  }
  0x5a   :  { %3380 = vsyncadd [#allocation4], 4294967040 }
  0x5b   :  { %3381 = dma.done.wait [#allocation7], 320  }
  0x5c   :  { %3382 = vsyncadd [#allocation7], 4294966976 }
  0x5d   :  { %3383 = dma.done.wait [#allocation10], 1632  }
  0x5e   :  { %3384 = vsyncadd [#allocation10], 4294965664  ;;  %v3398_v1 = vmov 0.0   ;;  %vm3399_vm0 = vmmov 0   ;;  %vm133_vm1 = vcmask 1043456   ;;  %v118_v3 = vld [vmem:[#allocation3] sm:$0xff]  ;;  %v309_v26 = vlaneseq }
  0x5f   :  { %2830 = vmatprep.subr.bf16.mxu0 %v3398_v1  ;;  %2832 = vmatprep.mubr.msk.bf16.mxu0 %vm3399_vm0, %v3398_v1  ;;  %v121_v2 = vld [vmem:[#allocation8] sm:$0xf]  ;;  %v119_v4 = vld [vmem:[#allocation3 + $0x8] sm:$0xff]  ;;  %vm129_vm2 = vcmask 64512   ;;  %v3114_v9 = vld [vmem:[%s4164_s4 + $0x14] ss:$8 sps:$4 sm:$0xff]  }
  0x60   :  { %v135_v5 = vsel %vm133_vm1, %v121_v2, 0  ;;  %v120_v6 = vpack.c.bf16 %v119_v4, %v118_v3  ;;  %v3111_v7 = vld [vmem:[%s4164_s4 + $0x4] ss:$8 sps:$4 sm:$0xff]   ;;  %v3113_v8 = vld [vmem:[%s4164_s4] ss:$8 sps:$4 sm:$0xff]   ;;  %v3400_v15 = vmov 0  }
  0x61   :  { %2831 = vmatpush3.bf16.msra.mxu0 %v135_v5  ;;  %363 = vmatprep.subr.bf16.mxu1 %v3111_v7  ;;  %v3116_v10 = vld [vmem:[%s4164_s4 + $0x10] ss:$8 sps:$4 sm:$0xff]   ;;  %v3117_v11 = vld [vmem:[%s4164_s4 + $0x24] ss:$8 sps:$4 sm:$0xff]   ;;  %v3119_v12 = vld [vmem:[%s4164_s4 + $0x20] ss:$8 sps:$4 sm:$0xff]  }
  0x62   :  { %2836 = vmatprep.subr.bf16.mxu0 %v3398_v1  ;;  %364 = vmatpush1.bf16.msra.mxu1 %v3113_v8  ;;  %v3120_v13 = vld [vmem:[%s4164_s4 + $0x34] ss:$8 sps:$4 sm:$0xff]   ;;  %v3122_v14 = vld [vmem:[%s4164_s4 + $0x30] ss:$8 sps:$4 sm:$0xff]   ;;  %v2614_v18 = vld [vmem:[%s4163_s3] ss:$0 sm:$0xff] }
  0x63   :  { %365 = vmatprep.subr.bf16.mxu1 %v3114_v9  ;;  %395 = vmatprep.mubr.bf16.mxu1 %v3400_v15  ;;  %v3575_v16 = vld [vmem:[#allocation6] sm:$0xff]   ;;  %v3580_v17 = vld [vmem:[#allocation6 + $0x8] sm:$0xff]   ;;  %vm359_vm3 = vcmask 523264   ;;  %v3596_v27 = vshrl.u32 %v309_v26, 7  ;;  %v202_v29 = vld [vmem:[#allocation9] sm:$0x3] }
  0x64   :  { %2833 = vmatmul.mubr.msk.bf16.vlgmr.msra.gmra.mrb[0].mxu0 %vm129_vm2, %v120_v6  ;;  %3109 = vset.pattern.permute.xlu1 %v3400_v15  ;;  %vm568_vm4 = vcmask 261120   ;;  %vm2546_vm5 = vcmask 1041409   ;;  %vm2595_vm6 = vcmask 8192  }
  0x65   :  { %2840 = vmatprep.mubr.msk.bf16.mxu0 %vm3399_vm0, %v3398_v1  ;;  %3110 = vset.pattern.permute.xlu0 %v3400_v15  ;;  %v3599_v28 = vsub.s32 0, %v3596_v27  ;;  %v3617_v49 = vsub.s32 1, %v3596_v27 }
  0x66   :  { %366 = vmatpush1.bf16.msra.mxu1 %v3116_v10  ;;  %432 = vrot.lane.b32.xlu0 %v3575_v16, %s3388_s19 }
  0x67   :  { %367 = vmatprep.subr.bf16.mxu1 %v3117_v11  ;;  %v312_v30 = vrot.slane %v202_v29, %v3599_v28  ;;  %v316_v50 = vrot.slane %v202_v29, %v3617_v49 }
  0x6a   :  { %368 = vmatpush1.bf16.msra.mxu1 %v3119_v12  ;;  %434 = vrot.lane.b32.xlu0 %v3580_v17, %s3388_s19 }
  0x6b   :  { %369 = vmatprep.subr.bf16.mxu1 %v3120_v13 }
  0x6e   :  { %370 = vmatpush1.bf16.msra.mxu1 %v3122_v14 }
  0x6f   :  { %2844 = vmatprep.subr.bf16.mxu1 %v3398_v1 }
  0xd8   :  { %v3602_v38 = vpop.permute.xlu0 %432 }
  0xdc   :  { %v3606_v44 = vpop.permute.xlu0 %434 }
 0x137   :  { %v171_v19 = vpop.f32.mrb[0].mxu0 }
 0x138   :  { %v2834_v20 = vpop.f32.mrb[1].mxu0  ;;  %v3587_v22 = vadd.f32 %v2614_v18, %v171_v19 }
 0x139   :  { %v174_v21 = vpop.f32.mrb[2].mxu0 }
 0x13a   :  { %v3589_v23 = vadd.f32 %v2614_v18, %v174_v21  ;;  %v2835_v24 = vpop.f32.mrb[3].mxu0 }
 0x13c   :  { %v307_v25 = vpack.c.bf16 %v3589_v23, %v3587_v22 }
 0x13e   :  { %2624 = vmatmul.mubr.msk.bf16.vlgmr.msra.gmra.mrb[0].mxu1 %vm359_vm3, %v307_v25 }
 0x13f   :  { %2848 = vmatprep.mubr.msk.bf16.mxu1 %vm3399_vm0, %v3398_v1 }
 0x211   :  { %v397_v31 = vpop.f32.mrb[0].mxu1 }
 0x212   :  { %v398_v32 = vadd.f32 %v397_v31, %v312_v30  ;;  %v399_v33 = vpop.f32.mrb[1].mxu1 }
 0x213   :  { %v401_v34 = vpop.f32.mrb[2].mxu1  ;;  %v400_v55 = vadd.f32 %v399_v33, %v316_v50 }
 0x214   :  { %v406_v35 = vpack.c.bf16 %v398_v32, %v398_v32  ;;  %v402_v36 = vadd.f32 %v401_v34, %v312_v30  ;;  %v403_v37 = vpop.f32.mrb[3].mxu1 }
 0x215   :  { %v404_v52 = vadd.f32 %v403_v37, %v316_v50  ;;  %v408_v59 = vpack.c.bf16 %v400_v55, %v400_v55  ;;  %v3126_v37 = vld [vmem:[%s4166_s6 + $0x8] sm:$0xff]  }
 0x216   :  { %v407_v39 = vpack.c.bf16 %v402_v36, %v402_v36  ;;  %v412_v40 = vrot.slane %v406_v35, 4  ;;  %v3125_v36 = vld [vmem:[%s4166_s6] sm:$0xff]  }
 0x217   :  { %v409_v58 = vpack.c.bf16 %v404_v52, %v404_v52  ;;  %v444_v63 = vrot.slane %v408_v59, 4 }
 0x218   :  { %v413_v41 = vrot.slane %v407_v39, 4  ;;  %v416_v42 = vsel %vm133_vm1, %v406_v35, %v412_v40  ;;  %v3128_v40 = vld [vmem:[%s4166_s6 + $0x18] sm:$0xff]  }
 0x219   :  { %v438_v43 = vmul.bf16 %v3602_v38, %v416_v42  ;;  %v439_v47 = vmul.bf16 %v3606_v44, %v416_v42  ;;  %v445_v61 = vrot.slane %v409_v58, 4  ;;  %v448_v3 = vsel %vm133_vm1, %v408_v59, %v444_v63 }
 0x21a   :  { %v420_v45 = vsel %vm133_vm1, %v407_v39, %v413_v41  ;;  %v456_v5 = vmul.bf16 %v3575_v16, %v448_v3  ;;  %v457_v7 = vmul.bf16 %v3580_v17, %v448_v3 }
 0x21b   :  { %462 = vrot.lane.b32.xlu1 %v438_v43, %s3388_s19  ;;  %v440_v46 = vmul.bf16 %v3602_v38, %v420_v45  ;;  %v441_v48 = vmul.bf16 %v3606_v44, %v420_v45  ;;  %v452_v2 = vsel %vm133_vm1, %v409_v58, %v445_v61 }
 0x21c   :  { %v458_v4 = vmul.bf16 %v3575_v16, %v452_v2  ;;  %v459_v6 = vmul.bf16 %v3580_v17, %v452_v2 }
 0x21d   :  { %516 = vrot.lane.b32.xlu0 %v440_v46, %s3388_s19 }
 0x21f   :  { %464 = vrot.lane.b32.xlu1 %v439_v47, %s3388_s19 }
 0x223   :  { %518 = vrot.lane.b32.xlu1 %v441_v48, %s3388_s19 }
 0x28d   :  { %v463_v51 = vpop.permute.xlu1 %462 }
 0x28e   :  { %v469_v53 = vsel %vm359_vm3, %v463_v51, 0 }
 0x28f   :  { %2837 = vmatpush3.bf16.xpose.msra.mxu0 %v469_v53  ;;  %v517_v54 = vpop.permute.xlu0 %516 }
 0x290   :  { %v523_v56 = vsel %vm359_vm3, %v517_v54, 0  ;;  %2838 = vmatprep.subr.bf16.mxu0 %v3398_v1 }
 0x291   :  { %v465_v57 = vpop.permute.xlu1 %464  ;;  %2845 = vmatpush3.bf16.xpose.msra.mxu1 %v523_v56 }
 0x292   :  { %2846 = vmatprep.subr.bf16.mxu1 %v3398_v1  ;;  %v472_v62 = vsel %vm359_vm3, %v465_v57, 0 }
 0x295   :  { %v519_v60 = vpop.permute.xlu1 %518 }
 0x296   :  { %v526_v0 = vsel %vm359_vm3, %v519_v60, 0 }
 0x297   :  { %2839 = vmatpush3.bf16.xpose.msra.mxu0 %v472_v62  ;;  %v3681_v62 = vld [vmem:[%s4170_s10] sm:$0x3f] }
 0x298   :  { %2860 = vmatprep.subr.bf16.mxu0 %v3398_v1  ;;  %v728_v63 = vrot.slane %v3681_v62, %v3599_v28 }
 0x299   :  { %2847 = vmatpush3.bf16.xpose.msra.mxu1 %v526_v0 }
 0x29a   :  { %2852 = vmatprep.subr.bf16.mxu1 %v3398_v1 }
 0x29e   :  { %2841 = vmatmul.mubr.msk.bf16.vlgmr.msra.gmra.mrb[4].mxu0 %vm359_vm3, %v406_v35 }
 0x29f   :  { %2861 = vmatpush3.bf16.msra.mxu0 %v458_v4  ;;  %2864 = vmatprep.mubr.msk.bf16.mxu0 %vm3399_vm0, %v3398_v1 }
 0x2a0   :  { %2849 = vmatmul.mubr.msk.bf16.vlgmr.msra.gmra.mrb[4].mxu1 %vm359_vm3, %v407_v39  ;;  %2862 = vmatprep.subr.bf16.mxu0 %v3398_v1  ;;  %v3127_v39 = vld [vmem:[%s4166_s6 + $0x10] sm:$0xff]  }
 0x2a1   :  { %2853 = vmatpush3.bf16.msra.mxu1 %v456_v5  ;;  %2856 = vmatprep.mubr.msk.bf16.mxu1 %vm3399_vm0, %v3398_v1 }
 0x2a2   :  { %2854 = vmatprep.subr.bf16.mxu1 %v3398_v1 }
 0x2a3   :  { %2863 = vmatpush3.bf16.msra.mxu0 %v459_v6 }
 0x2a4   :  { %2876 = vmatprep.subr.bf16.mxu0 %v3398_v1 }
 0x2a5   :  { %2855 = vmatpush3.bf16.msra.mxu1 %v457_v7 }
 0x2a6   :  { %2868 = vmatprep.subr.bf16.mxu1 %v3398_v1 }
 0x371   :  { %v508_v8 = vpop.f32.mrb[4].mxu0 }
 0x372   :  { %v2842_v9 = vpop.f32.mrb[5].mxu0  ;;  %v569_v10 = vsel %vm568_vm4, %v508_v8, -inf }
 0x373   :  { %570 = vmax.xlane.f32.xlu0 %v569_v10  ;;  %v511_v11 = vpop.f32.mrb[6].mxu0  ;;  %v562_v12 = vpop.f32.mrb[4].mxu1 }
 0x374   :  { %v2843_v13 = vpop.f32.mrb[7].mxu0  ;;  %v2850_v14 = vpop.f32.mrb[5].mxu1  ;;  %v572_v18 = vsel %vm568_vm4, %v562_v12, -inf }
 0x375   :  { %573 = vmax.xlane.f32.xlu1 %v572_v18  ;;  %v565_v19 = vpop.f32.mrb[6].mxu1  ;;  %v3129_v13 = vld [vmem:[#allocation11] sm:$0xff]   ;;  %v3130_v14 = vld [vmem:[#allocation11 + $0x8] sm:$0xff]   ;;  %v3131_v18 = vld [vmem:[#allocation11 + $0x10] sm:$0xff]  }
 0x376   :  { %v2851_v20 = vpop.f32.mrb[7].mxu1  ;;  %v3132_v19 = vld [vmem:[#allocation11 + $0x18] sm:$0xff]  }
 0x377   :  { %v3133_v20 = vld [vmem:[%s4169_s9] sm:$0xff]  }
 0x400   :  { %v571_v21 = vpop.xlane.xlu0 %570 }
 0x401   :  { %v575_v24 = vsub.f32 %v508_v8, %v571_v21  ;;  %v3134_v21 = vld [vmem:[%s4169_s9 + $0x8] sm:$0xff]  }
 0x402   :  { %v574_v25 = vpop.xlane.xlu1 %573 }
 0x403   :  { %v577_v26 = vmul.f32 1.442695, %v575_v24  ;;  %v576_v29 = vsub.f32 %v562_v12, %v574_v25  ;;  %v3135_v24 = vld [vmem:[%s4169_s9 + $0x10] sm:$0xff]   ;;  %v3136_v25 = vld [vmem:[%s4169_s9 + $0x18] sm:$0xff]  }
 0x405   :  { %3197 = vpow2.f32 %v577_v26  ;;  %v579_v30 = vmul.f32 1.442695, %v576_v29  ;;  %v3137_v26 = vld [vmem:[%s4169_s9 + $0x20] sm:$0xff]   ;;  %v3138_v29 = vld [vmem:[%s4169_s9 + $0x28] sm:$0xff]  }
 0x407   :  { %3199 = vpow2.f32 %v579_v30 }
 0x40f   :  { %v3198_v31 = vpop.eup %3197 }
 0x410   :  { %v581_v32 = vpack.c.bf16 %v3198_v31, %v3198_v31 }
 0x411   :  { %v3200_v33 = vpop.eup %3199 }
 0x412   :  { %2857 = vmatmul.mubr.msk.bf16.vlgmr.msra.gmra.mrb[8].mxu1 %vm568_vm4, %v581_v32  ;;  %v582_v34 = vpack.c.bf16 %v3200_v33, %v3200_v33  ;;  %v2721_v35 = vpack.c.bf16 %v3200_v33, %v3198_v31 }
 0x413   :  { %2869 = vmatpush3.bf16.msra.mxu1 %v3575_v16  ;;  %2872 = vmatprep.mubr.msk.bf16.mxu1 %vm3399_vm0, %v3398_v1 }
 0x414   :  { %2865 = vmatmul.mubr.msk.bf16.vlgmr.msra.gmra.mrb[8].mxu0 %vm568_vm4, %v582_v34  ;;  %2870 = vmatprep.subr.bf16.mxu1 %v3398_v1 }
 0x415   :  { %2884 = vmatprep.mubr.msk.bf16.mxu0 %vm3399_vm0, %v3398_v1  ;;  %2877 = vmatpush3.bf16.msra.mxu0 %v3125_v36 }
 0x416   :  { %2878 = vmatprep.subr.bf16.mxu0 %v3398_v1 }
 0x417   :  { %2871 = vmatpush3.bf16.msra.mxu1 %v3580_v17 }
 0x418   :  { %2888 = vmatprep.subr.bf16.mxu1 %v3398_v1 }
 0x419   :  { %2879 = vmatpush3.bf16.msra.mxu0 %v3126_v37 }
 0x41a   :  { %2873 = vmatmul.mubr.msk.bf16.vlgmr.msra.gmra.mrb[12].mxu1 %vm568_vm4, %v2721_v35  ;;  %2880 = vmatprep.subr.bf16.mxu0 %v3398_v1 }
 0x41b   :  { %2896 = vmatprep.mubr.msk.bf16.mxu1 %vm3399_vm0, %v3398_v1  ;;  %2889 = vmatpush3.bf16.msra.mxu1 %v3129_v13 }
 0x41c   :  { %2890 = vmatprep.subr.bf16.mxu1 %v3398_v1 }
 0x41d   :  { %2881 = vmatpush3.bf16.msra.mxu0 %v3127_v39 }
 0x41e   :  { %2882 = vmatprep.subr.bf16.mxu0 %v3398_v1 }
 0x41f   :  { %2891 = vmatpush3.bf16.msra.mxu1 %v3130_v14 }
 0x420   :  { %2892 = vmatprep.subr.bf16.mxu1 %v3398_v1 }
 0x421   :  { %2883 = vmatpush3.bf16.msra.mxu0 %v3128_v40 }
 0x422   :  { %2900 = vmatprep.subr.bf16.mxu0 %v3398_v1 }
 0x423   :  { %2893 = vmatpush3.bf16.msra.mxu1 %v3131_v18 }
 0x424   :  { %2894 = vmatprep.subr.bf16.mxu1 %v3398_v1 }
 0x427   :  { %2895 = vmatpush3.bf16.msra.mxu1 %v3132_v19 }
 0x4e5   :  { %v620_v41 = vpop.f32.mrb[8].mxu1 }
 0x4e6   :  { %v2858_v42 = vpop.f32.mrb[9].mxu1 }
 0x4e7   :  { %v623_v43 = vpop.f32.mrb[10].mxu1  ;;  %v663_v45 = vpop.f32.mrb[8].mxu0 }
 0x4e8   :  { %v2859_v46 = vpop.f32.mrb[11].mxu1  ;;  %v2866_v47 = vpop.f32.mrb[9].mxu0 }
 0x4e9   :  { %v666_v48 = vpop.f32.mrb[10].mxu0 }
 0x4ea   :  { %v2867_v50 = vpop.f32.mrb[11].mxu0 }
 0x4ed   :  { %v711_v51 = vpop.f32.mrb[12].mxu1 }
 0x4ee   :  { %v718_v52 = vmax.f32 %v711_v51, 1e-30  ;;  %v2874_v53 = vpop.f32.mrb[13].mxu1 }
 0x4ef   :  { %v714_v54 = vpop.f32.mrb[14].mxu1  ;;  %v3732_v53 = vsub.s32 2, %v3596_v27 }
 0x4f0   :  { %3201 = vrcp.f32 %v718_v52  ;;  %v719_v55 = vmax.f32 %v714_v54, 1e-30  ;;  %v2875_v56 = vpop.f32.mrb[15].mxu1  ;;  %v835_v52 = vrot.slane %v3681_v62, %v3617_v49 }
 0x4f2   :  { %3203 = vrcp.f32 %v719_v55 }
 0x4fa   :  { %v3202_v57 = vpop.eup %3201 }
 0x4fb   :  { %v722_v58 = vmul.f32 %v3202_v57, %v620_v41 }
 0x4fc   :  { %v3204_v59 = vpop.eup %3203 }
 0x4fd   :  { %v723_v60 = vmul.f32 %v3204_v59, %v663_v45 }
 0x4ff   :  { %v724_v61 = vpack.c.bf16 %v723_v60, %v722_v58  ;;  %v841_v58 = vrot.slane %v3681_v62, %v3732_v53 }
 0x501   :  { %2885 = vmatmul.mubr.msk.bf16.vlgmr.msra.gmra.mrb[12].mxu0 %vm359_vm3, %v724_v61 }
 0x502   :  { %2916 = vmatprep.mubr.msk.bf16.mxu0 %vm3399_vm0, %v3398_v1  ;;  %2901 = vmatpush3.bf16.msra.mxu0 %v3133_v20 }
 0x503   :  { %2902 = vmatprep.subr.bf16.mxu0 %v3398_v1 }
 0x506   :  { %2903 = vmatpush3.bf16.msra.mxu0 %v3134_v21 }
 0x507   :  { %2904 = vmatprep.subr.bf16.mxu0 %v3398_v1 }
 0x50a   :  { %2905 = vmatpush3.bf16.msra.mxu0 %v3135_v24 }
 0x50b   :  { %2906 = vmatprep.subr.bf16.mxu0 %v3398_v1 }
 0x50e   :  { %2907 = vmatpush3.bf16.msra.mxu0 %v3136_v25 }
 0x50f   :  { %2908 = vmatprep.subr.bf16.mxu0 %v3398_v1 }
 0x512   :  { %2909 = vmatpush3.bf16.msra.mxu0 %v3137_v26 }
 0x513   :  { %2910 = vmatprep.subr.bf16.mxu0 %v3398_v1 }
 0x516   :  { %2911 = vmatpush3.bf16.msra.mxu0 %v3138_v29 }
 0x517   :  { %2912 = vmatprep.subr.bf16.mxu0 %v3398_v1 }
 0x5d4   :  { %v790_v0 = vpop.f32.mrb[12].mxu0 }
 0x5d5   :  { %v791_v2 = vadd.f32 %v790_v0, %v728_v63  ;;  %v2886_v3 = vpop.f32.mrb[13].mxu0  ;;  %v3139_v0 = vld [vmem:[%s4169_s9 + $0x30] sm:$0xff]  }
 0x5d6   :  { %v793_v4 = vpop.f32.mrb[14].mxu0  ;;  %2913 = vmatpush3.bf16.msra.mxu0 %v3139_v0  ;;  %v2638_v3 = vld [vmem:[%s4168_s8] ss:$0 sm:$0xff] }
 0x5d7   :  { %v3686_v5 = vadd.f32 %v791_v2, %v3587_v22  ;;  %v794_v6 = vadd.f32 %v793_v4, %v728_v63  ;;  %v2887_v7 = vpop.f32.mrb[15].mxu0  ;;  %2914 = vmatprep.subr.bf16.mxu0 %v3398_v1  ;;  %v3140_v2 = vld [vmem:[%s4169_s9 + $0x38] sm:$0xff]  }
 0x5d9   :  { %v3689_v8 = vadd.f32 %v794_v6, %v3589_v23  ;;  %v799_v9 = vsel %vm359_vm3, %v3686_v5, 0.0  ;;  %v808_v10 = vmul.f32 %v3686_v5, %v3686_v5 }
 0x5da   :  { %800 = vadd.xlane.f32.xlu0 %v799_v9  ;;  %2915 = vmatpush3.bf16.msra.mxu0 %v3140_v2 }
 0x5db   :  { %v810_v11 = vsel %vm359_vm3, %v808_v10, 0.0  ;;  %v802_v12 = vsel %vm359_vm3, %v3689_v8, 0.0  ;;  %v809_v22 = vmul.f32 %v3689_v8, %v3689_v8  ;;  %2928 = vmatprep.subr.bf16.mxu0 %v3398_v1 }
 0x5dc   :  { %811 = vadd.xlane.f32.xlu1 %v810_v11 }
 0x5dd   :  { %v813_v23 = vsel %vm359_vm3, %v809_v22, 0.0  ;;  %v3753_v22 = vsub.s32 3, %v3596_v27 }
 0x5de   :  { %803 = vadd.xlane.f32.xlu0 %v802_v12 }
 0x5e2   :  { %814 = vadd.xlane.f32.xlu0 %v813_v23  ;;  %v925_v23 = vrot.slane %v3681_v62, %v3753_v22 }
 0x667   :  { %v801_v30 = vpop.xlane.xlu0 %800 }
 0x668   :  { %v806_v31 = vmul.f32 0.015625, %v801_v30 }
 0x669   :  { %v812_v32 = vpop.xlane.xlu1 %811 }
 0x66a   :  { %v818_v33 = vmul.f32 %v806_v31, %v806_v31  ;;  %v816_v34 = vmul.f32 0.015625, %v812_v32  ;;  %v824_v50 = vsub.f32 %v3686_v5, %v806_v31 }
 0x66b   :  { %v804_v35 = vpop.xlane.xlu0 %803 }
 0x66c   :  { %v820_v36 = vsub.f32 %v816_v34, %v818_v33  ;;  %v807_v37 = vmul.f32 0.015625, %v804_v35  ;;  %v3143_v34 = vld [vmem:[%s4164_s4 + $0x44] ss:$8 sps:$4 sm:$0xff]   ;;  %v3141_v35 = vld [vmem:[%s4164_s4 + $0x40] ss:$8 sps:$4 sm:$0xff]  }
 0x66d   :  { %1116 = vmatprep.subr.bf16.mxu1 %v3143_v34 }
 0x66e   :  { %v822_v39 = vmax.f32 %v820_v36, 0.0  ;;  %v819_v42 = vmul.f32 %v807_v37, %v807_v37  ;;  %v825_v54 = vsub.f32 %v3689_v8, %v807_v37  ;;  %v3146_v36 = vld [vmem:[%s4164_s4 + $0x54] ss:$8 sps:$4 sm:$0xff]   ;;  %v3144_v37 = vld [vmem:[%s4164_s4 + $0x50] ss:$8 sps:$4 sm:$0xff]  }
 0x66f   :  { %v815_v40 = vpop.xlane.xlu0 %814 }
 0x670   :  { %v826_v41 = vadd.f32 1e-05, %v822_v39  ;;  %v817_v43 = vmul.f32 0.015625, %v815_v40  ;;  %v3149_v39 = vld [vmem:[%s4164_s4 + $0x64] ss:$8 sps:$4 sm:$0xff]  }
 0x671   :  { %v3147_v40 = vld [vmem:[%s4164_s4 + $0x60] ss:$8 sps:$4 sm:$0xff]  }
 0x672   :  { %3205 = vrsqrt.f32 %v826_v41  ;;  %v821_v45 = vsub.f32 %v817_v43, %v819_v42  ;;  %v3152_v41 = vld [vmem:[%s4164_s4 + $0x74] ss:$8 sps:$4 sm:$0xff]   ;;  %v3150_v42 = vld [vmem:[%s4164_s4 + $0x70] ss:$8 sps:$4 sm:$0xff]  }
 0x674   :  { %v823_v46 = vmax.f32 %v821_v45, 0.0 }
 0x676   :  { %v827_v47 = vadd.f32 1e-05, %v823_v46 }
 0x678   :  { %3207 = vrsqrt.f32 %v827_v47 }
 0x67c   :  { %v3206_v48 = vpop.eup %3205 }
 0x67d   :  { %v830_v51 = vmul.f32 %v3206_v48, %v824_v50 }
 0x67f   :  { %v836_v57 = vmul.f32 %v835_v52, %v830_v51 }
 0x681   :  { %v842_v60 = vadd.f32 %v841_v58, %v836_v57 }
 0x682   :  { %v3208_v55 = vpop.eup %3207 }
 0x683   :  { %v831_v56 = vmul.f32 %v3208_v55, %v825_v54 }
 0x685   :  { %v837_v59 = vmul.f32 %v835_v52, %v831_v56 }
 0x687   :  { %v843_v61 = vadd.f32 %v841_v58, %v837_v59 }
 0x689   :  { %v844_v63 = vpack.c.bf16 %v843_v61, %v842_v60 }
 0x68b   :  { %2897 = vmatmul.mubr.msk.bf16.vlgmr.msra.gmra.mrb[16].mxu1 %vm359_vm3, %v844_v63  ;;  %v3787_v63 = vsub.s32 4, %v3596_v27 }
 0x68c   :  { %1148 = vmatprep.mubr.bf16.mxu1 %v3400_v15  ;;  %1117 = vmatpush1.bf16.msra.mxu1 %v3141_v35 }
 0x68d   :  { %1118 = vmatprep.subr.bf16.mxu1 %v3146_v36  ;;  %v1052_v2 = vrot.slane %v3681_v62, %v3787_v63 }
 0x690   :  { %1119 = vmatpush1.bf16.msra.mxu1 %v3144_v37 }
 0x691   :  { %1120 = vmatprep.subr.bf16.mxu1 %v3149_v39 }
 0x694   :  { %1121 = vmatpush1.bf16.msra.mxu1 %v3147_v40 }
 0x695   :  { %1122 = vmatprep.subr.bf16.mxu1 %v3152_v41 }
 0x698   :  { %1123 = vmatpush1.bf16.msra.mxu1 %v3150_v42 }
 0x699   :  { %2920 = vmatprep.subr.bf16.mxu1 %v3398_v1 }
 0x75e   :  { %v912_v4 = vpop.f32.mrb[16].mxu1 }
 0x75f   :  { %v913_v5 = vadd.f32 %v2638_v3, %v912_v4  ;;  %v2898_v6 = vpop.f32.mrb[17].mxu1 }
 0x760   :  { %v915_v7 = vpop.f32.mrb[18].mxu1 }
 0x761   :  { %v916_v8 = vadd.f32 %v2638_v3, %v915_v7  ;;  %v2899_v9 = vpop.f32.mrb[19].mxu1  ;;  %v919_v10 = vmax.f32 %v913_v5, 0.0  ;;  %v3792_v3 = vsub.s32 5, %v3596_v27  ;;  %v203_v27 = vld [vmem:[#allocation9 + $0x2] sm:$0x3] }
 0x763   :  { %v920_v11 = vmax.f32 %v916_v8, 0.0 }
 0x765   :  { %v921_v12 = vpack.c.bf16 %v920_v11, %v919_v10  ;;  %v1058_v10 = vrot.slane %v3681_v62, %v3792_v3  ;;  %v1070_v62 = vrot.slane %v203_v27, %v3617_v49 }
 0x767   :  { %2917 = vmatmul.mubr.bf16.vlgmr.msra.gmra.mrb[16].mxu0 %v921_v12 }
 0x768   :  { %2932 = vmatprep.mubr.msk.bf16.mxu0 %vm3399_vm0, %v3398_v1 }
 0x83a   :  { %v1008_v13 = vpop.f32.mrb[16].mxu0 }
 0x83b   :  { %v1009_v14 = vadd.f32 %v1008_v13, %v925_v23  ;;  %v2918_v18 = vpop.f32.mrb[17].mxu0 }
 0x83c   :  { %v1011_v19 = vpop.f32.mrb[18].mxu0 }
 0x83d   :  { %v1015_v20 = vadd.f32 %v1009_v14, %v842_v60  ;;  %v1012_v21 = vadd.f32 %v1011_v19, %v925_v23  ;;  %v2919_v24 = vpop.f32.mrb[19].mxu0  ;;  %v1066_v14 = vrot.slane %v203_v27, %v3599_v28 }
 0x83f   :  { %v1016_v25 = vadd.f32 %v1012_v21, %v843_v61  ;;  %v1017_v26 = vsel %vm359_vm3, %v1015_v20, 0.0  ;;  %v1025_v29 = vmul.f32 %v1015_v20, %v1015_v20 }
 0x840   :  { %1018 = vadd.xlane.f32.xlu1 %v1017_v26 }
 0x841   :  { %v1020_v30 = vsel %vm359_vm3, %v1016_v25, 0.0  ;;  %v1026_v31 = vmul.f32 %v1016_v25, %v1016_v25  ;;  %v1027_v32 = vsel %vm359_vm3, %v1025_v29, 0.0 }
 0x842   :  { %1021 = vadd.xlane.f32.xlu0 %v1020_v30 }
 0x843   :  { %v1030_v33 = vsel %vm359_vm3, %v1026_v31, 0.0 }
 0x844   :  { %1028 = vadd.xlane.f32.xlu1 %v1027_v32 }
 0x846   :  { %1031 = vadd.xlane.f32.xlu0 %v1030_v33 }
 0x8cd   :  { %v1019_v43 = vpop.xlane.xlu1 %1018 }
 0x8ce   :  { %v1023_v45 = vmul.f32 0.015625, %v1019_v43 }
 0x8cf   :  { %v1022_v46 = vpop.xlane.xlu0 %1021 }
 0x8d0   :  { %v1024_v47 = vmul.f32 0.015625, %v1022_v46  ;;  %v1035_v50 = vmul.f32 %v1023_v45, %v1023_v45  ;;  %v1041_v0 = vsub.f32 %v1015_v20, %v1023_v45 }
 0x8d1   :  { %v1029_v48 = vpop.xlane.xlu1 %1028 }
 0x8d2   :  { %v1033_v51 = vmul.f32 0.015625, %v1029_v48  ;;  %v1036_v54 = vmul.f32 %v1024_v47, %v1024_v47  ;;  %v1042_v5 = vsub.f32 %v1016_v25, %v1024_v47 }
 0x8d3   :  { %v1032_v52 = vpop.xlane.xlu0 %1031 }
 0x8d4   :  { %v1037_v55 = vsub.f32 %v1033_v51, %v1035_v50  ;;  %v1034_v56 = vmul.f32 0.015625, %v1032_v52 }
 0x8d6   :  { %v1039_v57 = vmax.f32 %v1037_v55, 0.0  ;;  %v1038_v58 = vsub.f32 %v1034_v56, %v1036_v54 }
 0x8d8   :  { %v1043_v59 = vadd.f32 1e-05, %v1039_v57  ;;  %v1040_v60 = vmax.f32 %v1038_v58, 0.0 }
 0x8da   :  { %3209 = vrsqrt.f32 %v1043_v59  ;;  %v1044_v61 = vadd.f32 1e-05, %v1040_v60 }
 0x8dc   :  { %3211 = vrsqrt.f32 %v1044_v61 }
 0x8e4   :  { %v3210_v4 = vpop.eup %3209 }
 0x8e5   :  { %v1047_v6 = vmul.f32 %v3210_v4, %v1041_v0 }
 0x8e6   :  { %v3212_v7 = vpop.eup %3211 }
 0x8e7   :  { %v1048_v8 = vmul.f32 %v3212_v7, %v1042_v5  ;;  %v1053_v9 = vmul.f32 %v1052_v2, %v1047_v6 }
 0x8e9   :  { %v1054_v11 = vmul.f32 %v1052_v2, %v1048_v8  ;;  %v3796_v12 = vadd.f32 %v1058_v10, %v1053_v9 }
 0x8eb   :  { %v3798_v23 = vadd.f32 %v1058_v10, %v1054_v11 }
 0x8ed   :  { %v1061_v13 = vpack.c.bf16 %v3798_v23, %v3796_v12 }
 0x8ef   :  { %2660 = vmatmul.mubr.msk.bf16.vlgmr.msra.gmra.mrb[20].mxu1 %vm359_vm3, %v1061_v13 }
 0x8f0   :  { %2924 = vmatprep.mubr.msk.bf16.mxu1 %vm3399_vm0, %v3398_v1 }
 0x9c2   :  { %v1150_v18 = vpop.f32.mrb[20].mxu1 }
 0x9c3   :  { %v1151_v19 = vadd.f32 %v1150_v18, %v1066_v14  ;;  %v1152_v20 = vpop.f32.mrb[21].mxu1 }
 0x9c4   :  { %v1154_v21 = vpop.f32.mrb[22].mxu1  ;;  %v1153_v41 = vadd.f32 %v1152_v20, %v1070_v62 }
 0x9c5   :  { %v1159_v24 = vpack.c.bf16 %v1151_v19, %v1151_v19  ;;  %v1155_v25 = vadd.f32 %v1154_v21, %v1066_v14  ;;  %v1156_v26 = vpop.f32.mrb[23].mxu1 }
 0x9c6   :  { %v3807_v29 = vadd.f32 %v1156_v26, %v1070_v62  ;;  %v1161_v47 = vpack.c.bf16 %v1153_v41, %v1153_v41 }
 0x9c7   :  { %v1165_v30 = vrot.slane %v1159_v24, 4  ;;  %v1160_v31 = vpack.c.bf16 %v1155_v25, %v1155_v25 }
 0x9c8   :  { %v1181_v50 = vrot.slane %v1161_v47, 4  ;;  %v1162_v27 = vpack.c.bf16 %v3807_v29, %v3807_v29  ;;  %v3155_v29 = vld [vmem:[%s4166_s6 + $0x30] sm:$0xff]  }
 0x9c9   :  { %v1166_v32 = vrot.slane %v1160_v31, 4  ;;  %v1169_v33 = vsel %vm133_vm1, %v1159_v24, %v1165_v30  ;;  %v3156_v30 = vld [vmem:[%s4166_s6 + $0x38] sm:$0xff]  }
 0x9ca   :  { %v1175_v34 = vmul.bf16 %v1169_v33, %v3602_v38  ;;  %v1176_v37 = vmul.bf16 %v1169_v33, %v3606_v44  ;;  %v1185_v54 = vsel %vm133_vm1, %v1161_v47, %v1181_v50  ;;  %v1182_v14 = vrot.slane %v1162_v27, 4 }
 0x9cb   :  { %v1173_v35 = vsel %vm133_vm1, %v1160_v31, %v1166_v32  ;;  %v1191_v55 = vmul.bf16 %v3575_v16, %v1185_v54  ;;  %v1192_v56 = vmul.bf16 %v3580_v17, %v1185_v54  ;;  %v3882_v54 = vld [vmem:[%s4170_s10 + $0x8] sm:$0x3f] }
 0x9cc   :  { %1197 = vrot.lane.b32.xlu1 %v1175_v34, %s3388_s19  ;;  %v1177_v36 = vmul.bf16 %v1173_v35, %v3602_v38  ;;  %v1178_v39 = vmul.bf16 %v1173_v35, %v3606_v44  ;;  %v1189_v18 = vsel %vm133_vm1, %v1162_v27, %v1182_v14  ;;  %v3162_v27 = vld [vmem:[%s4169_s9 + $0x48] sm:$0xff]   ;;  %v3163_v14 = vld [vmem:[%s4169_s9 + $0x50] sm:$0xff]  }
 0x9cd   :  { %v1193_v21 = vmul.bf16 %v3575_v16, %v1189_v18  ;;  %v1194_v25 = vmul.bf16 %v3580_v17, %v1189_v18  ;;  %v3164_v18 = vld [vmem:[%s4169_s9 + $0x58] sm:$0xff]  }
 0x9ce   :  { %1251 = vrot.lane.b32.xlu0 %v1177_v36, %s3388_s19 }
 0x9d0   :  { %1199 = vrot.lane.b32.xlu1 %v1176_v37, %s3388_s19 }
 0x9d4   :  { %1253 = vrot.lane.b32.xlu1 %v1178_v39, %s3388_s19 }
 0xa3e   :  { %v1198_v40 = vpop.permute.xlu1 %1197 }
 0xa3f   :  { %v1204_v42 = vsel %vm359_vm3, %v1198_v40, 0 }
 0xa40   :  { %v1252_v43 = vpop.permute.xlu0 %1251  ;;  %2921 = vmatpush3.bf16.xpose.msra.mxu1 %v1204_v42 }
 0xa41   :  { %v1258_v45 = vsel %vm359_vm3, %v1252_v43, 0  ;;  %2922 = vmatprep.subr.bf16.mxu1 %v3398_v1 }
 0xa42   :  { %2929 = vmatpush3.bf16.xpose.msra.mxu0 %v1258_v45  ;;  %v1200_v46 = vpop.permute.xlu1 %1199 }
 0xa43   :  { %2930 = vmatprep.subr.bf16.mxu0 %v3398_v1  ;;  %v1207_v51 = vsel %vm359_vm3, %v1200_v46, 0 }
 0xa46   :  { %v1254_v48 = vpop.permute.xlu1 %1253 }
 0xa47   :  { %v1261_v52 = vsel %vm359_vm3, %v1254_v48, 0 }
 0xa48   :  { %2923 = vmatpush3.bf16.xpose.msra.mxu1 %v1207_v51 }
 0xa49   :  { %2936 = vmatprep.subr.bf16.mxu1 %v3398_v1 }
 0xa4a   :  { %2931 = vmatpush3.bf16.xpose.msra.mxu0 %v1261_v52 }
 0xa4b   :  { %2952 = vmatprep.subr.bf16.mxu0 %v3398_v1 }
 0xa4f   :  { %2925 = vmatmul.mubr.msk.bf16.vlgmr.msra.gmra.mrb[24].mxu1 %vm359_vm3, %v1159_v24 }
 0xa50   :  { %2937 = vmatpush3.bf16.msra.mxu1 %v1191_v55  ;;  %2940 = vmatprep.mubr.msk.bf16.mxu1 %vm3399_vm0, %v3398_v1  ;;  %v1462_v55 = vrot.slane %v3882_v54, %v3599_v28 }
 0xa51   :  { %2933 = vmatmul.mubr.msk.bf16.vlgmr.msra.gmra.mrb[20].mxu0 %vm359_vm3, %v1160_v31  ;;  %2938 = vmatprep.subr.bf16.mxu1 %v3398_v1 }
 0xa52   :  { %2953 = vmatpush3.bf16.msra.mxu0 %v3575_v16  ;;  %2956 = vmatprep.mubr.msk.bf16.mxu0 %vm3399_vm0, %v3398_v1  ;;  %v3153_v16 = vld [vmem:[%s4166_s6 + $0x20] sm:$0xff]  }
 0xa53   :  { %2954 = vmatprep.subr.bf16.mxu0 %v3398_v1 }
 0xa54   :  { %2939 = vmatpush3.bf16.msra.mxu1 %v1192_v56 }
 0xa55   :  { %2944 = vmatprep.subr.bf16.mxu1 %v3398_v1 }
 0xa56   :  { %2955 = vmatpush3.bf16.msra.mxu0 %v3580_v17  ;;  %v3154_v17 = vld [vmem:[%s4166_s6 + $0x28] sm:$0xff]  }
 0xa57   :  { %2972 = vmatprep.subr.bf16.mxu0 %v3398_v1 }
 0xb22   :  { %v1243_v57 = vpop.f32.mrb[24].mxu1 }
 0xb23   :  { %v2926_v58 = vpop.f32.mrb[25].mxu1  ;;  %v1303_v59 = vsel %vm568_vm4, %v1243_v57, -inf }
 0xb24   :  { %1304 = vmax.xlane.f32.xlu0 %v1303_v59  ;;  %v1246_v60 = vpop.f32.mrb[26].mxu1  ;;  %v1297_v61 = vpop.f32.mrb[20].mxu0 }
 0xb25   :  { %v2927_v0 = vpop.f32.mrb[27].mxu1  ;;  %v2934_v2 = vpop.f32.mrb[21].mxu0  ;;  %v1306_v4 = vsel %vm568_vm4, %v1297_v61, -inf }
 0xb26   :  { %1307 = vmax.xlane.f32.xlu1 %v1306_v4  ;;  %v1300_v5 = vpop.f32.mrb[22].mxu0 }
 0xb27   :  { %v2935_v6 = vpop.f32.mrb[23].mxu0 }
 0xbb1   :  { %v1305_v7 = vpop.xlane.xlu0 %1304 }
 0xbb2   :  { %v1309_v8 = vsub.f32 %v1243_v57, %v1305_v7 }
 0xbb3   :  { %v1308_v9 = vpop.xlane.xlu1 %1307 }
 0xbb4   :  { %v1311_v10 = vmul.f32 1.442695, %v1309_v8  ;;  %v1310_v11 = vsub.f32 %v1297_v61, %v1308_v9  ;;  %v3157_v8 = vld [vmem:[#allocation11 + $0x20] sm:$0xff]   ;;  %v3158_v9 = vld [vmem:[#allocation11 + $0x28] sm:$0xff]  }
 0xbb6   :  { %3213 = vpow2.f32 %v1311_v10  ;;  %v1313_v13 = vmul.f32 1.442695, %v1310_v11  ;;  %v3159_v10 = vld [vmem:[#allocation11 + $0x30] sm:$0xff]   ;;  %v3160_v11 = vld [vmem:[#allocation11 + $0x38] sm:$0xff]  }
 0xbb8   :  { %3215 = vpow2.f32 %v1313_v13  ;;  %v3161_v13 = vld [vmem:[%s4169_s9 + $0x40] sm:$0xff]  }
 0xbc0   :  { %v3214_v19 = vpop.eup %3213 }
 0xbc1   :  { %v1315_v20 = vpack.c.bf16 %v3214_v19, %v3214_v19 }
 0xbc2   :  { %v3216_v62 = vpop.eup %3215 }
 0xbc3   :  { %2941 = vmatmul.mubr.msk.bf16.vlgmr.msra.gmra.mrb[28].mxu1 %vm568_vm4, %v1315_v20  ;;  %v2722_v24 = vpack.c.bf16 %v3216_v62, %v3214_v19  ;;  %v1316_v26 = vpack.c.bf16 %v3216_v62, %v3216_v62  ;;  %v3165_v19 = vld [vmem:[%s4169_s9 + $0x60] sm:$0xff]   ;;  %v3166_v20 = vld [vmem:[%s4169_s9 + $0x68] sm:$0xff]  }
 0xbc4   :  { %2945 = vmatpush3.bf16.msra.mxu1 %v1193_v21  ;;  %2948 = vmatprep.mubr.msk.bf16.mxu1 %vm3399_vm0, %v3398_v1 }
 0xbc5   :  { %2957 = vmatmul.mubr.msk.bf16.vlgmr.msra.gmra.mrb[24].mxu0 %vm568_vm4, %v2722_v24  ;;  %2946 = vmatprep.subr.bf16.mxu1 %v3398_v1 }
 0xbc6   :  { %2980 = vmatprep.mubr.msk.bf16.mxu0 %vm3399_vm0, %v3398_v1  ;;  %2973 = vmatpush3.bf16.msra.mxu0 %v3157_v8 }
 0xbc7   :  { %2974 = vmatprep.subr.bf16.mxu0 %v3398_v1 }
 0xbc8   :  { %2947 = vmatpush3.bf16.msra.mxu1 %v1194_v25 }
 0xbc9   :  { %2960 = vmatprep.subr.bf16.mxu1 %v3398_v1 }
 0xbca   :  { %2975 = vmatpush3.bf16.msra.mxu0 %v3158_v9 }
 0xbcb   :  { %2949 = vmatmul.mubr.msk.bf16.vlgmr.msra.gmra.mrb[32].mxu1 %vm568_vm4, %v1316_v26  ;;  %2976 = vmatprep.subr.bf16.mxu0 %v3398_v1 }
 0xbcc   :  { %2968 = vmatprep.mubr.msk.bf16.mxu1 %vm3399_vm0, %v3398_v1  ;;  %2961 = vmatpush3.bf16.msra.mxu1 %v3153_v16 }
 0xbcd   :  { %2962 = vmatprep.subr.bf16.mxu1 %v3398_v1 }
 0xbce   :  { %2977 = vmatpush3.bf16.msra.mxu0 %v3159_v10 }
 0xbcf   :  { %2978 = vmatprep.subr.bf16.mxu0 %v3398_v1 }
 0xbd0   :  { %2963 = vmatpush3.bf16.msra.mxu1 %v3154_v17 }
 0xbd1   :  { %2964 = vmatprep.subr.bf16.mxu1 %v3398_v1 }
 0xbd2   :  { %2979 = vmatpush3.bf16.msra.mxu0 %v3160_v11 }
 0xbd4   :  { %2965 = vmatpush3.bf16.msra.mxu1 %v3155_v29 }
 0xbd5   :  { %2966 = vmatprep.subr.bf16.mxu1 %v3398_v1 }
 0xbd8   :  { %2967 = vmatpush3.bf16.msra.mxu1 %v3156_v30 }
 0xbd9   :  { %2984 = vmatprep.subr.bf16.mxu1 %v3398_v1 }
 0xc96   :  { %v1354_v31 = vpop.f32.mrb[28].mxu1 }
 0xc97   :  { %v2942_v32 = vpop.f32.mrb[29].mxu1 }
 0xc98   :  { %v1357_v33 = vpop.f32.mrb[30].mxu1  ;;  %v1445_v34 = vpop.f32.mrb[24].mxu0 }
 0xc99   :  { %v1452_v35 = vmax.f32 %v1445_v34, 1e-30  ;;  %v2943_v36 = vpop.f32.mrb[31].mxu1  ;;  %v2958_v37 = vpop.f32.mrb[25].mxu0 }
 0xc9a   :  { %v1448_v39 = vpop.f32.mrb[26].mxu0 }
 0xc9b   :  { %3217 = vrcp.f32 %v1452_v35  ;;  %v1453_v40 = vmax.f32 %v1448_v39, 1e-30  ;;  %v2959_v41 = vpop.f32.mrb[27].mxu0 }
 0xc9d   :  { %3219 = vrcp.f32 %v1453_v40 }
 0xc9e   :  { %v1397_v42 = vpop.f32.mrb[32].mxu1 }
 0xc9f   :  { %v2950_v43 = vpop.f32.mrb[33].mxu1 }
 0xca0   :  { %v1400_v45 = vpop.f32.mrb[34].mxu1 }
 0xca1   :  { %v2951_v46 = vpop.f32.mrb[35].mxu1 }
 0xca5   :  { %v3218_v47 = vpop.eup %3217 }
 0xca6   :  { %v1456_v48 = vmul.f32 %v3218_v47, %v1354_v31 }
 0xca7   :  { %v3220_v50 = vpop.eup %3219 }
 0xca8   :  { %v1457_v51 = vmul.f32 %v3220_v50, %v1397_v42  ;;  %v1568_v42 = vrot.slane %v3882_v54, %v3617_v49 }
 0xcaa   :  { %v1458_v52 = vpack.c.bf16 %v1457_v51, %v1456_v48  ;;  %v1574_v48 = vrot.slane %v3882_v54, %v3732_v53 }
 0xcac   :  { %2969 = vmatmul.mubr.msk.bf16.vlgmr.msra.gmra.mrb[36].mxu1 %vm359_vm3, %v1458_v52 }
 0xcad   :  { %3000 = vmatprep.mubr.msk.bf16.mxu1 %vm3399_vm0, %v3398_v1  ;;  %2985 = vmatpush3.bf16.msra.mxu1 %v3161_v13 }
 0xcae   :  { %2986 = vmatprep.subr.bf16.mxu1 %v3398_v1 }
 0xcb1   :  { %2987 = vmatpush3.bf16.msra.mxu1 %v3162_v27 }
 0xcb2   :  { %2988 = vmatprep.subr.bf16.mxu1 %v3398_v1 }
 0xcb5   :  { %2989 = vmatpush3.bf16.msra.mxu1 %v3163_v14 }
 0xcb6   :  { %2990 = vmatprep.subr.bf16.mxu1 %v3398_v1 }
 0xcb9   :  { %2991 = vmatpush3.bf16.msra.mxu1 %v3164_v18 }
 0xcba   :  { %2992 = vmatprep.subr.bf16.mxu1 %v3398_v1 }
 0xcbd   :  { %2993 = vmatpush3.bf16.msra.mxu1 %v3165_v19 }
 0xcbe   :  { %2994 = vmatprep.subr.bf16.mxu1 %v3398_v1 }
 0xcc1   :  { %2995 = vmatpush3.bf16.msra.mxu1 %v3166_v20 }
 0xcc2   :  { %2996 = vmatprep.subr.bf16.mxu1 %v3398_v1 }
 0xd7f   :  { %v1524_v56 = vpop.f32.mrb[36].mxu1 }
 0xd80   :  { %v1525_v57 = vadd.f32 %v1524_v56, %v1462_v55  ;;  %v2970_v58 = vpop.f32.mrb[37].mxu1  ;;  %v3167_v56 = vld [vmem:[%s4169_s9 + $0x70] sm:$0xff]  }
 0xd81   :  { %v1527_v59 = vpop.f32.mrb[38].mxu1  ;;  %2997 = vmatpush3.bf16.msra.mxu1 %v3167_v56  ;;  %v2672_v58 = vld [vmem:[%s4168_s8 + $0x1] ss:$0 sm:$0xff] }
 0xd82   :  { %v3887_v60 = vadd.f32 %v1525_v57, %v3796_v12  ;;  %v1528_v61 = vadd.f32 %v1527_v59, %v1462_v55  ;;  %v2971_v0 = vpop.f32.mrb[39].mxu1  ;;  %2998 = vmatprep.subr.bf16.mxu1 %v3398_v1  ;;  %v3168_v57 = vld [vmem:[%s4169_s9 + $0x78] sm:$0xff]  }
 0xd84   :  { %v3890_v2 = vadd.f32 %v1528_v61, %v3798_v23  ;;  %v1533_v4 = vsel %vm359_vm3, %v3887_v60, 0.0  ;;  %v1541_v5 = vmul.f32 %v3887_v60, %v3887_v60 }
 0xd85   :  { %1534 = vadd.xlane.f32.xlu0 %v1533_v4  ;;  %2999 = vmatpush3.bf16.msra.mxu1 %v3168_v57 }
 0xd86   :  { %v1543_v6 = vsel %vm359_vm3, %v1541_v5, 0.0  ;;  %v1536_v7 = vsel %vm359_vm3, %v3890_v2, 0.0  ;;  %v1542_v12 = vmul.f32 %v3890_v2, %v3890_v2  ;;  %3012 = vmatprep.subr.bf16.mxu1 %v3398_v1 }
 0xd87   :  { %1544 = vadd.xlane.f32.xlu1 %v1543_v6 }
 0xd88   :  { %v1546_v23 = vsel %vm359_vm3, %v1542_v12, 0.0 }
 0xd89   :  { %1537 = vadd.xlane.f32.xlu0 %v1536_v7  ;;  %v1658_v7 = vrot.slane %v3882_v54, %v3753_v22 }
 0xd8d   :  { %1547 = vadd.xlane.f32.xlu0 %v1546_v23 }
 0xe12   :  { %v1535_v62 = vpop.xlane.xlu0 %1534 }
 0xe13   :  { %v1539_v21 = vmul.f32 0.015625, %v1535_v62 }
 0xe14   :  { %v1545_v24 = vpop.xlane.xlu1 %1544 }
 0xe15   :  { %v1551_v25 = vmul.f32 %v1539_v21, %v1539_v21  ;;  %v1549_v26 = vmul.f32 0.015625, %v1545_v24  ;;  %v1557_v40 = vsub.f32 %v3887_v60, %v1539_v21  ;;  %v3171_v24 = vld [vmem:[%s4164_s4 + $0x84] ss:$8 sps:$4 sm:$0xff]  }
 0xe16   :  { %v1538_v16 = vpop.xlane.xlu0 %1537  ;;  %1849 = vmatprep.subr.bf16.mxu0 %v3171_v24 }
 0xe17   :  { %v1553_v17 = vsub.f32 %v1549_v26, %v1551_v25  ;;  %v1540_v29 = vmul.f32 0.015625, %v1538_v16  ;;  %v3169_v25 = vld [vmem:[%s4164_s4 + $0x80] ss:$8 sps:$4 sm:$0xff]   ;;  %v3174_v26 = vld [vmem:[%s4164_s4 + $0x94] ss:$8 sps:$4 sm:$0xff]  }
 0xe18   :  { %v3172_v16 = vld [vmem:[%s4164_s4 + $0x90] ss:$8 sps:$4 sm:$0xff]  }
 0xe19   :  { %v1555_v30 = vmax.f32 %v1553_v17, 0.0  ;;  %v1552_v33 = vmul.f32 %v1540_v29, %v1540_v29  ;;  %v1558_v43 = vsub.f32 %v3890_v2, %v1540_v29  ;;  %v3177_v17 = vld [vmem:[%s4164_s4 + $0xa4] ss:$8 sps:$4 sm:$0xff]   ;;  %v3175_v29 = vld [vmem:[%s4164_s4 + $0xa0] ss:$8 sps:$4 sm:$0xff]  }
 0xe1a   :  { %v1548_v31 = vpop.xlane.xlu0 %1547 }
 0xe1b   :  { %v1559_v32 = vadd.f32 1e-05, %v1555_v30  ;;  %v1550_v34 = vmul.f32 0.015625, %v1548_v31  ;;  %v3180_v30 = vld [vmem:[%s4164_s4 + $0xb4] ss:$8 sps:$4 sm:$0xff]  }
 0xe1c   :  { %v3178_v31 = vld [vmem:[%s4164_s4 + $0xb0] ss:$8 sps:$4 sm:$0xff]  }
 0xe1d   :  { %3221 = vrsqrt.f32 %v1559_v32  ;;  %v1554_v35 = vsub.f32 %v1550_v34, %v1552_v33 }
 0xe1f   :  { %v1556_v36 = vmax.f32 %v1554_v35, 0.0 }
 0xe21   :  { %v1560_v37 = vadd.f32 1e-05, %v1556_v36 }
 0xe23   :  { %3223 = vrsqrt.f32 %v1560_v37 }
 0xe27   :  { %v3222_v39 = vpop.eup %3221 }
 0xe28   :  { %v1563_v41 = vmul.f32 %v3222_v39, %v1557_v40 }
 0xe2a   :  { %v1569_v47 = vmul.f32 %v1568_v42, %v1563_v41 }
 0xe2c   :  { %v1575_v51 = vadd.f32 %v1574_v48, %v1569_v47 }
 0xe2d   :  { %v3224_v45 = vpop.eup %3223 }
 0xe2e   :  { %v1564_v46 = vmul.f32 %v3224_v45, %v1558_v43 }
 0xe30   :  { %v1570_v50 = vmul.f32 %v1568_v42, %v1564_v46 }
 0xe32   :  { %v1576_v52 = vadd.f32 %v1574_v48, %v1570_v50 }
 0xe34   :  { %v1577_v55 = vpack.c.bf16 %v1576_v52, %v1575_v51 }
 0xe36   :  { %2981 = vmatmul.mubr.msk.bf16.vlgmr.msra.gmra.mrb[28].mxu0 %vm359_vm3, %v1577_v55 }
 0xe37   :  { %1881 = vmatprep.mubr.bf16.mxu0 %v3400_v15  ;;  %1850 = vmatpush1.bf16.msra.mxu0 %v3169_v25 }
 0xe38   :  { %1851 = vmatprep.subr.bf16.mxu0 %v3174_v26 }
 0xe3b   :  { %1852 = vmatpush1.bf16.msra.mxu0 %v3172_v16 }
 0xe3c   :  { %1853 = vmatprep.subr.bf16.mxu0 %v3177_v17 }
 0xe3f   :  { %1854 = vmatpush1.bf16.msra.mxu0 %v3175_v29 }
 0xe40   :  { %1855 = vmatprep.subr.bf16.mxu0 %v3180_v30 }
 0xe43   :  { %1856 = vmatpush1.bf16.msra.mxu0 %v3178_v31 }
 0xe44   :  { %3004 = vmatprep.subr.bf16.mxu0 %v3398_v1 }
 0xf09   :  { %v1645_v59 = vpop.f32.mrb[28].mxu0 }
 0xf0a   :  { %v1646_v15 = vadd.f32 %v2672_v58, %v1645_v59  ;;  %v2982_v60 = vpop.f32.mrb[29].mxu0 }
 0xf0b   :  { %v1648_v61 = vpop.f32.mrb[30].mxu0  ;;  %v1791_v60 = vrot.slane %v3882_v54, %v3792_v3 }
 0xf0c   :  { %v1649_v0 = vadd.f32 %v2672_v58, %v1648_v61  ;;  %v2983_v2 = vpop.f32.mrb[31].mxu0  ;;  %v1652_v4 = vmax.f32 %v1646_v15, 0.0 }
 0xf0e   :  { %v1653_v5 = vmax.f32 %v1649_v0, 0.0 }
 0xf10   :  { %v1654_v6 = vpack.c.bf16 %v1653_v5, %v1652_v4  ;;  %v204_v5 = vld [vmem:[#allocation9 + $0x4] sm:$0x3] }
 0xf12   :  { %3001 = vmatmul.mubr.bf16.vlgmr.msra.gmra.mrb[40].mxu1 %v1654_v6  ;;  %v1799_v6 = vrot.slane %v204_v5, %v3599_v28 }
 0xf13   :  { %3016 = vmatprep.mubr.msk.bf16.mxu1 %vm3399_vm0, %v3398_v1 }
 0xfe5   :  { %v1741_v12 = vpop.f32.mrb[40].mxu1 }
 0xfe6   :  { %v1742_v23 = vadd.f32 %v1741_v12, %v1658_v7  ;;  %v3002_v8 = vpop.f32.mrb[41].mxu1 }
 0xfe7   :  { %v1744_v9 = vpop.f32.mrb[42].mxu1 }
 0xfe8   :  { %v1748_v10 = vadd.f32 %v1742_v23, %v1575_v51  ;;  %v1745_v11 = vadd.f32 %v1744_v9, %v1658_v7  ;;  %v3003_v13 = vpop.f32.mrb[43].mxu1 }
 0xfea   :  { %v1749_v27 = vadd.f32 %v1745_v11, %v1576_v52  ;;  %v1750_v14 = vsel %vm359_vm3, %v1748_v10, 0.0  ;;  %v1758_v18 = vmul.f32 %v1748_v10, %v1748_v10  ;;  %v1785_v52 = vrot.slane %v3882_v54, %v3787_v63 }
 0xfeb   :  { %1751 = vadd.xlane.f32.xlu1 %v1750_v14  ;;  %v1803_v54 = vrot.slane %v204_v5, %v3617_v49 }
 0xfec   :  { %v1753_v19 = vsel %vm359_vm3, %v1749_v27, 0.0  ;;  %v1759_v20 = vmul.f32 %v1749_v27, %v1749_v27  ;;  %v1760_v62 = vsel %vm359_vm3, %v1758_v18, 0.0 }
 0xfed   :  { %1754 = vadd.xlane.f32.xlu0 %v1753_v19 }
 0xfee   :  { %v1763_v21 = vsel %vm359_vm3, %v1759_v20, 0.0 }
 0xfef   :  { %1761 = vadd.xlane.f32.xlu1 %v1760_v62 }
 0xff1   :  { %1764 = vadd.xlane.f32.xlu0 %v1763_v21 }
0x1078   :  { %v1752_v32 = vpop.xlane.xlu1 %1751 }
0x1079   :  { %v1756_v33 = vmul.f32 0.015625, %v1752_v32 }
0x107a   :  { %v1755_v34 = vpop.xlane.xlu0 %1754 }
0x107b   :  { %v1757_v35 = vmul.f32 0.015625, %v1755_v34  ;;  %v1768_v37 = vmul.f32 %v1756_v33, %v1756_v33  ;;  %v1774_v51 = vsub.f32 %v1748_v10, %v1756_v33 }
0x107c   :  { %v1762_v36 = vpop.xlane.xlu1 %1761 }
0x107d   :  { %v1766_v39 = vmul.f32 0.015625, %v1762_v36  ;;  %v1769_v41 = vmul.f32 %v1757_v35, %v1757_v35  ;;  %v1775_v56 = vsub.f32 %v1749_v27, %v1757_v35  ;;  %v3245_v36 = vld [vmem:[#allocation6] sm:$0xff]  }
0x107e   :  { %v1765_v40 = vpop.xlane.xlu0 %1764 }
0x107f   :  { %v1770_v42 = vsub.f32 %v1766_v39, %v1768_v37  ;;  %v1767_v43 = vmul.f32 0.015625, %v1765_v40  ;;  %v3246_v39 = vld [vmem:[#allocation6 + $0x8] sm:$0xff]  }
0x1081   :  { %v1772_v45 = vmax.f32 %v1770_v42, 0.0  ;;  %v1771_v46 = vsub.f32 %v1767_v43, %v1769_v41 }
0x1083   :  { %v1776_v47 = vadd.f32 1e-05, %v1772_v45  ;;  %v1773_v48 = vmax.f32 %v1771_v46, 0.0 }
0x1085   :  { %3225 = vrsqrt.f32 %v1776_v47  ;;  %v1777_v50 = vadd.f32 1e-05, %v1773_v48 }
0x1087   :  { %3227 = vrsqrt.f32 %v1777_v50 }
0x108f   :  { %v3226_v55 = vpop.eup %3225 }
0x1090   :  { %v1780_v57 = vmul.f32 %v3226_v55, %v1774_v51 }
0x1091   :  { %v3228_v58 = vpop.eup %3227 }
0x1092   :  { %v1781_v59 = vmul.f32 %v3228_v58, %v1775_v56  ;;  %v1786_v15 = vmul.f32 %v1785_v52, %v1780_v57 }
0x1094   :  { %v1787_v61 = vmul.f32 %v1785_v52, %v1781_v59  ;;  %v3985_v0 = vadd.f32 %v1791_v60, %v1786_v15 }
0x1096   :  { %v3987_v2 = vadd.f32 %v1791_v60, %v1787_v61 }
0x1098   :  { %v1794_v4 = vpack.c.bf16 %v3987_v2, %v3985_v0 }
0x109a   :  { %2694 = vmatmul.mubr.msk.bf16.vlgmr.msra.gmra.mrb[32].mxu0 %vm359_vm3, %v1794_v4 }
0x109b   :  { %3008 = vmatprep.mubr.msk.bf16.mxu0 %vm3399_vm0, %v3398_v1 }
0x116d   :  { %v1883_v7 = vpop.f32.mrb[32].mxu0 }
0x116e   :  { %v1884_v12 = vadd.f32 %v1883_v7, %v1799_v6  ;;  %v1885_v23 = vpop.f32.mrb[33].mxu0 }
0x116f   :  { %v1887_v8 = vpop.f32.mrb[34].mxu0  ;;  %v1886_v16 = vadd.f32 %v1885_v23, %v1803_v54 }
0x1170   :  { %v1892_v9 = vpack.c.bf16 %v1884_v12, %v1884_v12  ;;  %v1888_v10 = vadd.f32 %v1887_v8, %v1799_v6  ;;  %v1889_v11 = vpop.f32.mrb[35].mxu0 }
0x1171   :  { %v3996_v13 = vadd.f32 %v1889_v11, %v1803_v54  ;;  %v1894_v31 = vpack.c.bf16 %v1886_v16, %v1886_v16  ;;  %v3183_v11 = vld [vmem:[%s4166_s6 + $0x50] sm:$0xff]  }
0x1172   :  { %v1898_v27 = vrot.slane %v1892_v9, 4  ;;  %v1893_v14 = vpack.c.bf16 %v1888_v10, %v1888_v10  ;;  %v3182_v10 = vld [vmem:[%s4166_s6 + $0x48] sm:$0xff]  }
0x1173   :  { %v1914_v33 = vrot.slane %v1894_v31, 4  ;;  %v1895_v60 = vpack.c.bf16 %v3996_v13, %v3996_v13  ;;  %v3184_v13 = vld [vmem:[%s4166_s6 + $0x58] sm:$0xff]  }
0x1174   :  { %v1899_v18 = vrot.slane %v1893_v14, 4  ;;  %v1902_v19 = vsel %vm133_vm1, %v1892_v9, %v1898_v27 }
0x1175   :  { %v1908_v20 = vmul.bf16 %v1902_v19, %v3602_v38  ;;  %v1909_v24 = vmul.bf16 %v1902_v19, %v3606_v44  ;;  %v1918_v35 = vsel %vm133_vm1, %v1894_v31, %v1914_v33  ;;  %v1915_v61 = vrot.slane %v1895_v60, 4 }
0x1176   :  { %v1906_v62 = vsel %vm133_vm1, %v1893_v14, %v1899_v18  ;;  %v1924_v37 = vmul.bf16 %v3245_v36, %v1918_v35  ;;  %v1925_v40 = vmul.bf16 %v3246_v39, %v1918_v35 }
0x1177   :  { %1930 = vrot.lane.b32.xlu1 %v1908_v20, %s3388_s19  ;;  %v1910_v21 = vmul.bf16 %v1906_v62, %v3602_v38  ;;  %v1911_v25 = vmul.bf16 %v1906_v62, %v3606_v44  ;;  %v1922_v4 = vsel %vm133_vm1, %v1895_v60, %v1915_v61  ;;  %v3193_v60 = vld [vmem:[%s4169_s9 + $0xa0] sm:$0xff]   ;;  %v3194_v61 = vld [vmem:[%s4169_s9 + $0xa8] sm:$0xff]  }
0x1178   :  { %v1926_v12 = vmul.bf16 %v3245_v36, %v1922_v4  ;;  %v1927_v54 = vmul.bf16 %v3246_v39, %v1922_v4 }
0x1179   :  { %1984 = vrot.lane.b32.xlu0 %v1910_v21, %s3388_s19 }
0x117b   :  { %1932 = vrot.lane.b32.xlu1 %v1909_v24, %s3388_s19 }
0x117f   :  { %1986 = vrot.lane.b32.xlu1 %v1911_v25, %s3388_s19  ;;  %s3401_s19 = smov [#allocation12]  }
0x1180   :  { %s2603_s24 = sshll.u32 %s3401_s19, 4  ;;  %s2604_s24 = int_to_ptr.vmem [resolvable:$true] %s2603_s24 }
0x1181   :  { %s3357_s15 = scalar_lea.vmem %s2604_s24, 16  ;;  %s3361_s16 = scalar_lea.vmem %s2604_s24, 32 }
0x1182   :  { %p3358_p12 = scmp.ne.s32.totalorder %s2604_s24, %s3357_s15  ;;  %p3362_p13 = scmp.lt.s32.totalorder %s2604_s24, %s2604_s24 }
0x1183   :  { %p3363_p0 = scmp.lt.s32.totalorder %s3361_s16, %s3357_s15 }
0x1185   :  { %p3364_p1 = por %p3363_p0, %p3362_p13 }
0x1187   :  { %p3365_p2 = pnand %p3364_p1, %p3358_p12 }
0x11e9   :  { %v1931_v26 = vpop.permute.xlu1 %1930 }
0x11ea   :  { %v1937_v17 = vsel %vm359_vm3, %v1931_v26, 0 }
0x11eb   :  { %v1985_v29 = vpop.permute.xlu0 %1984  ;;  %3005 = vmatpush3.bf16.xpose.msra.mxu0 %v1937_v17 }
0x11ec   :  { %v1991_v30 = vsel %vm359_vm3, %v1985_v29, 0  ;;  %3006 = vmatprep.subr.bf16.mxu0 %v3398_v1 }
0x11ed   :  { %3013 = vmatpush3.bf16.xpose.msra.mxu1 %v1991_v30  ;;  %v1933_v38 = vpop.permute.xlu1 %1932 }
0x11ee   :  { %3014 = vmatprep.subr.bf16.mxu1 %v3398_v1  ;;  %v1940_v44 = vsel %vm359_vm3, %v1933_v38, 0 }
0x11f1   :  { %v1987_v32 = vpop.permute.xlu1 %1986 }
0x11f2   :  { %v1994_v34 = vsel %vm359_vm3, %v1987_v32, 0 }
0x11f3   :  { %3007 = vmatpush3.bf16.xpose.msra.mxu0 %v1940_v44 }
0x11f4   :  { %3020 = vmatprep.subr.bf16.mxu0 %v3398_v1 }
0x11f5   :  { %3015 = vmatpush3.bf16.xpose.msra.mxu1 %v1994_v34  ;;  %v4065_v34 = vld [vmem:[%s4170_s10 + $0x10] sm:$0x3f] }
0x11f6   :  { %3036 = vmatprep.subr.bf16.mxu1 %v3398_v1  ;;  %v2195_v35 = vrot.slane %v4065_v34, %v3599_v28 }
0x11fa   :  { %3009 = vmatmul.mubr.msk.bf16.vlgmr.msra.gmra.mrb[36].mxu0 %vm359_vm3, %v1892_v9  ;;  %v3181_v9 = vld [vmem:[%s4166_s6 + $0x40] sm:$0xff]  }
0x11fb   :  { %3021 = vmatpush3.bf16.msra.mxu0 %v1924_v37  ;;  %3024 = vmatprep.mubr.msk.bf16.mxu0 %vm3399_vm0, %v3398_v1 }
0x11fc   :  { %3017 = vmatmul.mubr.msk.bf16.vlgmr.msra.gmra.mrb[44].mxu1 %vm359_vm3, %v1893_v14  ;;  %3022 = vmatprep.subr.bf16.mxu0 %v3398_v1 }
0x11fd   :  { %3037 = vmatpush3.bf16.msra.mxu1 %v3245_v36  ;;  %3040 = vmatprep.mubr.msk.bf16.mxu1 %vm3399_vm0, %v3398_v1 }
0x11fe   :  { %3038 = vmatprep.subr.bf16.mxu1 %v3398_v1 }
0x11ff   :  { %3023 = vmatpush3.bf16.msra.mxu0 %v1925_v40 }
0x1200   :  { %3028 = vmatprep.subr.bf16.mxu0 %v3398_v1 }
0x1201   :  { %3039 = vmatpush3.bf16.msra.mxu1 %v3246_v39 }
0x1202   :  { %3056 = vmatprep.subr.bf16.mxu1 %v3398_v1 }
0x12cd   :  { %v1976_v41 = vpop.f32.mrb[36].mxu0 }
0x12ce   :  { %v3010_v42 = vpop.f32.mrb[37].mxu0  ;;  %v2036_v43 = vsel %vm568_vm4, %v1976_v41, -inf }
0x12cf   :  { %2037 = vmax.xlane.f32.xlu0 %v2036_v43  ;;  %v1979_v45 = vpop.f32.mrb[38].mxu0  ;;  %v2030_v46 = vpop.f32.mrb[44].mxu1 }
0x12d0   :  { %v3011_v47 = vpop.f32.mrb[39].mxu0  ;;  %v3018_v48 = vpop.f32.mrb[45].mxu1  ;;  %v2039_v50 = vsel %vm568_vm4, %v2030_v46, -inf }
0x12d1   :  { %2040 = vmax.xlane.f32.xlu1 %v2039_v50  ;;  %v2033_v51 = vpop.f32.mrb[46].mxu1 }
0x12d2   :  { %v3019_v52 = vpop.f32.mrb[47].mxu1  ;;  %v3185_v51 = vld [vmem:[#allocation11 + $0x40] sm:$0xff]  }
0x12d3   :  { %v3186_v52 = vld [vmem:[#allocation11 + $0x48] sm:$0xff]  }
0x135c   :  { %v2038_v55 = vpop.xlane.xlu0 %2037 }
0x135d   :  { %v2042_v56 = vsub.f32 %v1976_v41, %v2038_v55  ;;  %v3187_v55 = vld [vmem:[#allocation11 + $0x50] sm:$0xff]  }
0x135e   :  { %v2041_v57 = vpop.xlane.xlu1 %2040 }
0x135f   :  { %v2044_v58 = vmul.f32 1.442695, %v2042_v56  ;;  %v2043_v59 = vsub.f32 %v2030_v46, %v2041_v57  ;;  %v3188_v56 = vld [vmem:[#allocation11 + $0x58] sm:$0xff]  }
0x1360   :  { %v3189_v57 = vld [vmem:[%s4169_s9 + $0x80] sm:$0xff]  }
0x1361   :  { %3229 = vpow2.f32 %v2044_v58  ;;  %v2046_v15 = vmul.f32 1.442695, %v2043_v59  ;;  %v3190_v58 = vld [vmem:[%s4169_s9 + $0x88] sm:$0xff]   ;;  %v3191_v59 = vld [vmem:[%s4169_s9 + $0x90] sm:$0xff]  }
0x1363   :  { %3231 = vpow2.f32 %v2046_v15  ;;  %v3192_v15 = vld [vmem:[%s4169_s9 + $0x98] sm:$0xff]  }
0x136b   :  { %v3230_v5 = vpop.eup %3229 }
0x136c   :  { %v2048_v6 = vpack.c.bf16 %v3230_v5, %v3230_v5 }
0x136d   :  { %v3232_v7 = vpop.eup %3231 }
0x136e   :  { %3025 = vmatmul.mubr.msk.bf16.vlgmr.msra.gmra.mrb[40].mxu0 %vm568_vm4, %v2048_v6  ;;  %v2723_v23 = vpack.c.bf16 %v3232_v7, %v3230_v5  ;;  %v2049_v8 = vpack.c.bf16 %v3232_v7, %v3232_v7 }
0x136f   :  { %3029 = vmatpush3.bf16.msra.mxu0 %v1926_v12  ;;  %3032 = vmatprep.mubr.msk.bf16.mxu0 %vm3399_vm0, %v3398_v1 }
0x1370   :  { %3041 = vmatmul.mubr.msk.bf16.vlgmr.msra.gmra.mrb[48].mxu1 %vm568_vm4, %v2723_v23  ;;  %3030 = vmatprep.subr.bf16.mxu0 %v3398_v1 }
0x1371   :  { %3064 = vmatprep.mubr.msk.bf16.mxu1 %vm3399_vm0, %v3398_v1  ;;  %3057 = vmatpush3.bf16.msra.mxu1 %v3185_v51 }
0x1372   :  { %3058 = vmatprep.subr.bf16.mxu1 %v3398_v1 }
0x1373   :  { %3031 = vmatpush3.bf16.msra.mxu0 %v1927_v54 }
0x1374   :  { %3044 = vmatprep.subr.bf16.mxu0 %v3398_v1 }
0x1375   :  { %3059 = vmatpush3.bf16.msra.mxu1 %v3186_v52 }
0x1376   :  { %3033 = vmatmul.mubr.msk.bf16.vlgmr.msra.gmra.mrb[44].mxu0 %vm568_vm4, %v2049_v8  ;;  %3060 = vmatprep.subr.bf16.mxu1 %v3398_v1 }
0x1377   :  { %3052 = vmatprep.mubr.msk.bf16.mxu0 %vm3399_vm0, %v3398_v1  ;;  %3045 = vmatpush3.bf16.msra.mxu0 %v3181_v9 }
0x1378   :  { %3046 = vmatprep.subr.bf16.mxu0 %v3398_v1 }
0x1379   :  { %3061 = vmatpush3.bf16.msra.mxu1 %v3187_v55 }
0x137a   :  { %3062 = vmatprep.subr.bf16.mxu1 %v3398_v1 }
0x137b   :  { %3047 = vmatpush3.bf16.msra.mxu0 %v3182_v10 }
0x137c   :  { %3048 = vmatprep.subr.bf16.mxu0 %v3398_v1 }
0x137d   :  { %3063 = vmatpush3.bf16.msra.mxu1 %v3188_v56 }
0x137e   :  { %3088 = vmatprep.subr.bf16.mxu1 %v3398_v1 }
0x137f   :  { %3049 = vmatpush3.bf16.msra.mxu0 %v3183_v11 }
0x1380   :  { %3050 = vmatprep.subr.bf16.mxu0 %v3398_v1 }
0x1383   :  { %3051 = vmatpush3.bf16.msra.mxu0 %v3184_v13 }
0x1384   :  { %3068 = vmatprep.subr.bf16.mxu0 %v3398_v1 }
0x1441   :  { %v2087_v27 = vpop.f32.mrb[40].mxu0 }
0x1442   :  { %v3026_v14 = vpop.f32.mrb[41].mxu0 }
0x1443   :  { %v2090_v18 = vpop.f32.mrb[42].mxu0  ;;  %v2178_v19 = vpop.f32.mrb[48].mxu1 }
0x1444   :  { %v2185_v20 = vmax.f32 %v2178_v19, 1e-30  ;;  %v3027_v62 = vpop.f32.mrb[43].mxu0  ;;  %v3042_v21 = vpop.f32.mrb[49].mxu1 }
0x1445   :  { %v2181_v24 = vpop.f32.mrb[50].mxu1 }
0x1446   :  { %3233 = vrcp.f32 %v2185_v20  ;;  %v2186_v25 = vmax.f32 %v2181_v24, 1e-30  ;;  %v3043_v26 = vpop.f32.mrb[51].mxu1  ;;  %v2301_v24 = vrot.slane %v4065_v34, %v3617_v49  ;;  %v3195_v49 = vld [vmem:[%s4169_s9 + $0xb0] sm:$0xff]  }
0x1448   :  { %3235 = vrcp.f32 %v2186_v25 }
0x1449   :  { %v2130_v16 = vpop.f32.mrb[44].mxu0 }
0x144a   :  { %v3034_v17 = vpop.f32.mrb[45].mxu0 }
0x144b   :  { %v2133_v29 = vpop.f32.mrb[46].mxu0 }
0x144c   :  { %v3035_v30 = vpop.f32.mrb[47].mxu0  ;;  %v2307_v29 = vrot.slane %v4065_v34, %v3732_v53  ;;  %v3196_v53 = vld [vmem:[%s4169_s9 + $0xb8] sm:$0xff]  }
0x1450   :  { %v3234_v38 = vpop.eup %3233 }
0x1451   :  { %v2189_v31 = vmul.f32 %v3234_v38, %v2087_v27 }
0x1452   :  { %v3236_v32 = vpop.eup %3235 }
0x1453   :  { %v2190_v33 = vmul.f32 %v3236_v32, %v2130_v16 }
0x1455   :  { %v2191_v44 = vpack.c.bf16 %v2190_v33, %v2189_v31  ;;  %v2706_v33 = vld [vmem:[%s4168_s8 + $0x2] ss:$0 sm:$0xff] }
0x1457   :  { %3053 = vmatmul.mubr.msk.bf16.vlgmr.msra.gmra.mrb[48].mxu0 %vm359_vm3, %v2191_v44 }
0x1458   :  { %3084 = vmatprep.mubr.msk.bf16.mxu0 %vm3399_vm0, %v3398_v1  ;;  %3069 = vmatpush3.bf16.msra.mxu0 %v3189_v57 }
0x1459   :  { %3070 = vmatprep.subr.bf16.mxu0 %v3398_v1 }
0x145c   :  { %3071 = vmatpush3.bf16.msra.mxu0 %v3190_v58 }
0x145d   :  { %3072 = vmatprep.subr.bf16.mxu0 %v3398_v1 }
0x1460   :  { %3073 = vmatpush3.bf16.msra.mxu0 %v3191_v59  ;;  %v2530_v59 = vld [vmem:[#allocation2] sm:$0x1] }
0x1461   :  { %3074 = vmatprep.subr.bf16.mxu0 %v3398_v1 }
0x1464   :  { %3075 = vmatpush3.bf16.msra.mxu0 %v3192_v15 }
0x1465   :  { %3076 = vmatprep.subr.bf16.mxu0 %v3398_v1 }
0x1468   :  { %3077 = vmatpush3.bf16.msra.mxu0 %v3193_v60 }
0x1469   :  { %3078 = vmatprep.subr.bf16.mxu0 %v3398_v1 }
0x146c   :  { %3079 = vmatpush3.bf16.msra.mxu0 %v3194_v61 }
0x146d   :  { %3080 = vmatprep.subr.bf16.mxu0 %v3398_v1 }
0x1470   :  { %3081 = vmatpush3.bf16.msra.mxu0 %v3195_v49 }
0x1471   :  { %3082 = vmatprep.subr.bf16.mxu0 %v3398_v1 }
0x1474   :  { %3083 = vmatpush3.bf16.msra.mxu0 %v3196_v53 }
0x152a   :  { %v2257_v36 = vpop.f32.mrb[48].mxu0 }
0x152b   :  { %v2258_v37 = vadd.f32 %v2257_v36, %v2195_v35  ;;  %v3054_v39 = vpop.f32.mrb[49].mxu0 }
0x152c   :  { %v2260_v40 = vpop.f32.mrb[50].mxu0 }
0x152d   :  { %v4070_v41 = vadd.f32 %v2258_v37, %v3985_v0  ;;  %v2261_v42 = vadd.f32 %v2260_v40, %v2195_v35  ;;  %v3055_v43 = vpop.f32.mrb[51].mxu0 }
0x152f   :  { %v4073_v45 = vadd.f32 %v2261_v42, %v3987_v2  ;;  %v2266_v46 = vsel %vm359_vm3, %v4070_v41, 0.0  ;;  %v2274_v47 = vmul.f32 %v4070_v41, %v4070_v41 }
0x1530   :  { %2267 = vadd.xlane.f32.xlu0 %v2266_v46 }
0x1531   :  { %v2276_v48 = vsel %vm359_vm3, %v2274_v47, 0.0  ;;  %v2269_v50 = vsel %vm359_vm3, %v4073_v45, 0.0  ;;  %v2275_v0 = vmul.f32 %v4073_v45, %v4073_v45 }
0x1532   :  { %2277 = vadd.xlane.f32.xlu1 %v2276_v48 }
0x1533   :  { %v2279_v2 = vsel %vm359_vm3, %v2275_v0, 0.0 }
0x1534   :  { %2270 = vadd.xlane.f32.xlu0 %v2269_v50 }
0x1538   :  { %2280 = vadd.xlane.f32.xlu0 %v2279_v2 }
0x15bd   :  { %v2268_v4 = vpop.xlane.xlu0 %2267 }
0x15be   :  { %v2272_v5 = vmul.f32 0.015625, %v2268_v4 }
0x15bf   :  { %v2278_v6 = vpop.xlane.xlu1 %2277 }
0x15c0   :  { %v2284_v7 = vmul.f32 %v2272_v5, %v2272_v5  ;;  %v2282_v12 = vmul.f32 0.015625, %v2278_v6  ;;  %v2290_v62 = vsub.f32 %v4070_v41, %v2272_v5 }
0x15c1   :  { %v2271_v23 = vpop.xlane.xlu0 %2270 }
0x15c2   :  { %v2286_v54 = vsub.f32 %v2282_v12, %v2284_v7  ;;  %v2273_v8 = vmul.f32 0.015625, %v2271_v23 }
0x15c4   :  { %v2288_v9 = vmax.f32 %v2286_v54, 0.0  ;;  %v2285_v13 = vmul.f32 %v2273_v8, %v2273_v8  ;;  %v2291_v25 = vsub.f32 %v4073_v45, %v2273_v8 }
0x15c5   :  { %v2281_v10 = vpop.xlane.xlu0 %2280 }
0x15c6   :  { %v2292_v11 = vadd.f32 1e-05, %v2288_v9  ;;  %v2283_v27 = vmul.f32 0.015625, %v2281_v10 }
0x15c8   :  { %3237 = vrsqrt.f32 %v2292_v11  ;;  %v2287_v14 = vsub.f32 %v2283_v27, %v2285_v13 }
0x15ca   :  { %v2289_v18 = vmax.f32 %v2287_v14, 0.0 }
0x15cc   :  { %v2293_v19 = vadd.f32 1e-05, %v2289_v18  ;;  %v2518_v18 = vrot.slane %v4065_v34, %v3787_v63 }
0x15ce   :  { %3239 = vrsqrt.f32 %v2293_v19 }
0x15d2   :  { %v3238_v20 = vpop.eup %3237 }
0x15d3   :  { %v2296_v21 = vmul.f32 %v3238_v20, %v2290_v62 }
0x15d5   :  { %v2302_v17 = vmul.f32 %v2301_v24, %v2296_v21  ;;  %v2524_v21 = vrot.slane %v4065_v34, %v3792_v3  ;;  %v2527_v3 = vld [vmem:[%s4171_s11] sm:$0x1] }
0x15d7   :  { %v2308_v38 = vadd.f32 %v2307_v29, %v2302_v17 }
0x15d8   :  { %v3240_v26 = vpop.eup %3239 }
0x15d9   :  { %v2297_v16 = vmul.f32 %v3240_v26, %v2291_v25 }
0x15db   :  { %v2303_v30 = vmul.f32 %v2301_v24, %v2297_v16 }
0x15dd   :  { %v2309_v31 = vadd.f32 %v2307_v29, %v2303_v30 }
0x15df   :  { %v2310_v32 = vpack.c.bf16 %v2309_v31, %v2308_v38 }
0x15e1   :  { %3065 = vmatmul.mubr.msk.bf16.vlgmr.msra.gmra.mrb[52].mxu1 %vm359_vm3, %v2310_v32 }
0x15e2   :  { %3090 = vmatprep.mubr.msk.bf16.mxu1 %vm3399_vm0, %v3398_v1  ;;  %v2391_v1 = vrot.slane %v4065_v34, %v3753_v22 }
0x16b4   :  { %v2378_v44 = vpop.f32.mrb[52].mxu1 }
0x16b5   :  { %v2379_v35 = vadd.f32 %v2706_v33, %v2378_v44  ;;  %v3066_v36 = vpop.f32.mrb[53].mxu1 }
0x16b6   :  { %v2381_v37 = vpop.f32.mrb[54].mxu1 }
0x16b7   :  { %v2382_v39 = vadd.f32 %v2706_v33, %v2381_v37  ;;  %v3067_v40 = vpop.f32.mrb[55].mxu1  ;;  %v2385_v41 = vmax.f32 %v2379_v35, 0.0 }
0x16b9   :  { %v2386_v42 = vmax.f32 %v2382_v39, 0.0 }
0x16bb   :  { %v2387_v43 = vpack.c.bf16 %v2386_v42, %v2385_v41 }
0x16bd   :  { %3085 = vmatmul.mubr.bf16.vlgmr.msra.gmra.mrb[52].mxu0 %v2387_v43 }
0x1790   :  { %v2474_v45 = vpop.f32.mrb[52].mxu0 }
0x1791   :  { %v2475_v46 = vadd.f32 %v2474_v45, %v2391_v1  ;;  %v3086_v47 = vpop.f32.mrb[53].mxu0 }
0x1792   :  { %v2477_v48 = vpop.f32.mrb[54].mxu0 }
0x1793   :  { %v2481_v50 = vadd.f32 %v2475_v46, %v2308_v38  ;;  %v2478_v0 = vadd.f32 %v2477_v48, %v2391_v1  ;;  %v3087_v2 = vpop.f32.mrb[55].mxu0 }
0x1795   :  { %v2482_v51 = vadd.f32 %v2478_v0, %v2309_v31  ;;  %v2483_v52 = vsel %vm359_vm3, %v2481_v50, 0.0  ;;  %v2491_v55 = vmul.f32 %v2481_v50, %v2481_v50 }
0x1796   :  { %2484 = vadd.xlane.f32.xlu1 %v2483_v52 }
0x1797   :  { %v2486_v56 = vsel %vm359_vm3, %v2482_v51, 0.0  ;;  %v2492_v57 = vmul.f32 %v2482_v51, %v2482_v51  ;;  %v2493_v58 = vsel %vm359_vm3, %v2491_v55, 0.0 }
0x1798   :  { %2487 = vadd.xlane.f32.xlu0 %v2486_v56 }
0x1799   :  { %v2496_v22 = vsel %vm359_vm3, %v2492_v57, 0.0 }
0x179a   :  { %2494 = vadd.xlane.f32.xlu1 %v2493_v58 }
0x179c   :  { %2497 = vadd.xlane.f32.xlu0 %v2496_v22 }
0x17ab   :  { %2533 = vperm.xlu1 %3109, %v2530_v59  }
0x1823   :  { %v2485_v15 = vpop.xlane.xlu1 %2484 }
0x1824   :  { %v2489_v60 = vmul.f32 0.015625, %v2485_v15 }
0x1825   :  { %v2488_v61 = vpop.xlane.xlu0 %2487 }
0x1826   :  { %v2490_v4 = vmul.f32 0.015625, %v2488_v61  ;;  %v2501_v6 = vmul.f32 %v2489_v60, %v2489_v60  ;;  %v2507_v14 = vsub.f32 %v2481_v50, %v2489_v60 }
0x1827   :  { %v2495_v5 = vpop.xlane.xlu1 %2494 }
0x1828   :  { %v2499_v7 = vmul.f32 0.015625, %v2495_v5  ;;  %v2502_v23 = vmul.f32 %v2490_v4, %v2490_v4  ;;  %v2508_v20 = vsub.f32 %v2482_v51, %v2490_v4 }
0x1829   :  { %v2498_v12 = vpop.xlane.xlu0 %2497 }
0x182a   :  { %v2503_v54 = vsub.f32 %v2499_v7, %v2501_v6  ;;  %v2500_v8 = vmul.f32 0.015625, %v2498_v12 }
0x182b   :  { %v2534_v34 = vpop.permute.xlu1 %2533 }
0x182c   :  { %v2505_v9 = vmax.f32 %v2503_v54, 0.0  ;;  %v2504_v10 = vsub.f32 %v2500_v8, %v2502_v23  ;;  %v2539_v35 = vrot.slane %v2534_v34, %v3599_v28 }
0x182e   :  { %v2509_v11 = vadd.f32 1e-05, %v2505_v9  ;;  %v2506_v13 = vmax.f32 %v2504_v10, 0.0 }
0x1830   :  { %3241 = vrsqrt.f32 %v2509_v11  ;;  %v2510_v27 = vadd.f32 1e-05, %v2506_v13 }
0x1832   :  { %3243 = vrsqrt.f32 %v2510_v27 }
0x183a   :  { %v3242_v19 = vpop.eup %3241 }
0x183b   :  { %v2513_v62 = vmul.f32 %v3242_v19, %v2507_v14 }
0x183c   :  { %v3244_v24 = vpop.eup %3243 }
0x183d   :  { %v2514_v25 = vmul.f32 %v3244_v24, %v2508_v20  ;;  %v2519_v26 = vmul.f32 %v2518_v18, %v2513_v62 }
0x183f   :  { %v2520_v16 = vmul.f32 %v2518_v18, %v2514_v25  ;;  %v2525_v17 = vadd.f32 %v2524_v21, %v2519_v26 }
0x1841   :  { %v2526_v29 = vadd.f32 %v2524_v21, %v2520_v16  ;;  %v2528_v30 = vpack.c.bf16 %v2525_v17, %v2525_v17 }
0x1843   :  { %v2529_v38 = vpack.c.bf16 %v2526_v29, %v2526_v29  ;;  %v2542_v31 = vunpack.c.l.b16 %v2528_v30 }
0x1845   :  { %v2543_v32 = vunpack.c.l.b16 %v2529_v38  ;;  %v2544_v49 = vrot.slane %v2542_v31, 7 }
0x1847   :  { %v2545_v53 = vrot.slane %v2543_v32, 6 }
0x1849   :  { %v2547_v63 = vsel %vm2546_vm5, %v2545_v53, %v2544_v49 }
0x184a   :  { %v2548_v33 = vpack.c.b16 %v2547_v63, %v2547_v63 }
0x184c   :  { %v2553_v44 = vsel %vm359_vm3, %v2548_v33, 0 }
0x184d   :  { %3089 = vmatpush3.bf16.xpose.msra.mxu1 %v2553_v44 }
0x1854   :  { %3091 = vmatmul.mubr.msk.bf16.vlgmr.msra.gmra.mrb[56].mxu1 %vm359_vm3, %v2527_v3 }
0x1927   :  { %v2589_v36 = vpop.f32.mrb[56].mxu1 }
0x1928   :  { %v2590_v37 = vadd.f32 %v2589_v36, %v2539_v35  ;;  %v3092_v39 = vpop.f32.mrb[57].mxu1 }
0x1929   :  { %v2592_v40 = vpop.f32.mrb[58].mxu1 }
0x192a   :  { %v3093_v41 = vpop.f32.mrb[59].mxu1  ;;  %2596 = vst.msk [vmem:[#allocation12] sm:$0x1] %vm2595_vm6, %v2590_v37 }
0x192b   :  { %3368 = shalt.err (!%p3365_p2)
}
0x192c   :  { %s3369_s3 = scalar_lea.hbm %s4173_s13, 16 }
0x192d   :  { %p3370_p3 = scmp.ne.s32.totalorder %s4173_s13, %s3369_s3  ;;  %p3373_p4 = scmp.lt.u32.totalorder %s3369_s3, %s4173_s13 }
0x192f   :  { %p3375_p5 = pnand %p3373_p4, %p3370_p3 }
0x1931   :  { %3378 = shalt.err (!%p3375_p5)
}
0x1932   :  { %2606 = dma.vmem_to_hbm [thread:$0]  %s2604_s24, 16, %s4173_s13, [#allocation5]  }
0x1933   :  { %3385 = dma.done.wait [#allocation5], 16  }
0x1934   :  { %3386 = vsyncadd [#allocation5], 4294967280 }
0x1935   :  { %2610 = vsyncpa [#allocation4], 1 }
0x1936   :  { %2611 = vsyncpa [#allocation7], 1 }
0x1937   :  { %2612 = vsyncpa [#allocation10], 1 }
0x1938   :  { %2613 = vsyncpa [#allocation5], 1 }

</bundles_post_ra>
